<compile_context>
chip_gen: v7x
topology: tpu7x:2x2x1
jax: 0.10.0
libtpu: 0.0.40
codegen_flags: <defaults>
</compile_context>

<pallas_src>
import jax
import jax.numpy as jnp
from jax.experimental import pallas as pl
from jax.experimental.pallas import tpu as pltpu


def _round_up(x, m):
    return (x + m - 1) // m * m


_VMEM_LIMIT = 48 * 1024 * 1024  # fits v5e/v6e/v7x


# ---------------------------------------------------------------------------
# Conv (im2col) matmul kernel: y = relu(patches @ w + b), rows tiled on grid.
# patches/w are bf16, accumulation f32; output is lane-dense (N padded to 128).
# ---------------------------------------------------------------------------
def _conv_mm_kernel(p_ref, w_ref, b_ref, o_ref):
    y = jnp.dot(p_ref[...], w_ref[...], preferred_element_type=jnp.float32)
    o_ref[...] = jnp.maximum(y + b_ref[...], 0.0)


def conv_matmul_relu(patches, w, b, *, tm=128):
    """patches: (R, K) bf16, w: (K, N) bf16, b: (1, N) f32 -> (R, N) f32."""
    R, K = patches.shape
    N = w.shape[1]
    rp = _round_up(R, tm)
    if rp != R:
        patches = jnp.pad(patches, ((0, rp - R), (0, 0)))
    out = pl.pallas_call(
        _conv_mm_kernel,
        out_shape=jax.ShapeDtypeStruct((rp, N), jnp.float32),
        grid_spec=pltpu.PrefetchScalarGridSpec(
            num_scalar_prefetch=0,
            grid=(rp // tm,),
            in_specs=[
                pl.BlockSpec((tm, K), lambda i: (i, 0)),
                pl.BlockSpec((K, N), lambda i: (0, 0)),
                pl.BlockSpec((1, N), lambda i: (0, 0)),
            ],
            out_specs=pl.BlockSpec((tm, N), lambda i: (i, 0)),
        ),
        compiler_params=pltpu.CompilerParams(
            dimension_semantics=("parallel",),  # shards rows across TCs on v7x
            vmem_limit_bytes=_VMEM_LIMIT,
        ),
    )(patches, w, b)
    return out[:R]


# ---------------------------------------------------------------------------
# Fused MLP head: ONE kernel for all three layers.
#   grid axis = K-tiles of layer-1 (reduction, "arbitrary", last axis).
#   acc_ref (M, 1024) f32 scratch accumulates x @ w1 across K tiles; on the
#   last tile we apply bias/ReLU and run layers 2 and 3 (weights VMEM-resident
#   across the whole K loop since their index_map is constant), then tanh.
# ---------------------------------------------------------------------------
def _mlp_fused_kernel(x_ref, w1_ref, b1_ref, w2_ref, b2_ref, w3_ref, b3_ref,
                      o_ref, acc_ref):
    k = pl.program_id(0)

    @pl.when(k == 0)
    def _():
        acc_ref[...] = jnp.zeros_like(acc_ref)

    acc_ref[...] += jnp.dot(x_ref[...], w1_ref[...],
                            preferred_element_type=jnp.float32)

    @pl.when(k == pl.num_programs(0) - 1)
    def _():
        h1 = jnp.maximum(acc_ref[...] + b1_ref[...], 0.0)          # f32
        h2 = jnp.dot(h1.astype(jnp.bfloat16), w2_ref[...],
                     preferred_element_type=jnp.float32)
        h2 = jnp.maximum(h2 + b2_ref[...], 0.0)
        h3 = jnp.dot(h2.astype(jnp.bfloat16), w3_ref[...],
                     preferred_element_type=jnp.float32)
        o_ref[...] = jnp.tanh(h3 + b3_ref[...])


def mlp_fused(x, w1, b1, w2, b2, w3, b3, *, block_k):
    """x: (M, Kp) bf16, w1: (Kp, H1) bf16, w2: (H1, H2) bf16, w3: (H2, NP) bf16,
    biases f32 (1, ·). Kp must be a multiple of block_k. Returns (M, NP) f32."""
    M, Kp = x.shape
    H1 = w1.shape[1]
    H2 = w2.shape[1]
    NP = w3.shape[1]
    nk = Kp // block_k
    return pl.pallas_call(
        _mlp_fused_kernel,
        out_shape=jax.ShapeDtypeStruct((M, NP), jnp.float32),
        grid_spec=pltpu.PrefetchScalarGridSpec(
            num_scalar_prefetch=0,
            grid=(nk,),
            in_specs=[
                pl.BlockSpec((M, block_k), lambda k: (0, k)),   # x K-tile
                pl.BlockSpec((block_k, H1), lambda k: (k, 0)),  # w1 K-tile (streamed)
                pl.BlockSpec((1, H1), lambda k: (0, 0)),        # b1 (resident)
                pl.BlockSpec((H1, H2), lambda k: (0, 0)),       # w2 (resident)
                pl.BlockSpec((1, H2), lambda k: (0, 0)),        # b2
                pl.BlockSpec((H2, NP), lambda k: (0, 0)),       # w3 (lane-padded)
                pl.BlockSpec((1, NP), lambda k: (0, 0)),        # b3
            ],
            out_specs=pl.BlockSpec((M, NP), lambda k: (0, 0)),  # resident output
            scratch_shapes=[pltpu.VMEM((M, H1), jnp.float32)],  # layer-1 accumulator
        ),
        compiler_params=pltpu.CompilerParams(
            dimension_semantics=("arbitrary",),  # K is a reduction axis
            vmem_limit_bytes=_VMEM_LIMIT,
        ),
    )(x, w1, b1, w2, b2, w3, b3)


# ---------------------------------------------------------------------------
# Simple CNN backbone: Conv2d(Cin->Cout, k=3, s=2, p=1) + ReLU via im2col.
# ---------------------------------------------------------------------------
# TODO(synk): fold the im2col into the Pallas conv kernel via an index_map
# over (oh, ow) tiles of the padded input, removing the HBM patch matrix.
def cnn_forward(x, conv_w, conv_b):
    N, C, H, W = x.shape
    Cout, _, KH, KW = conv_w.shape
    stride, pad = 2, 1
    OH = (H + 2 * pad - KH) // stride + 1
    OW = (W + 2 * pad - KW) // stride + 1

    xp = jnp.pad(x, ((0, 0), (0, 0), (pad, pad), (pad, pad)))
    cols = []
    for ki in range(KH):
        for kj in range(KW):
            cols.append(
                xp[:, :, ki:ki + stride * OH:stride, kj:kj + stride * OW:stride]
            )  # each (N, C, OH, OW)
    # rows ordered (n, oh, ow); features ordered (C, kh, kw) to match
    # PyTorch's conv_w.reshape(Cout, C*KH*KW).
    patches = jnp.stack(cols, axis=2)                       # (N, C, KH*KW, OH, OW)
    patches = patches.transpose(0, 3, 4, 1, 2).reshape(N * OH * OW, C * KH * KW)

    Kc = C * KH * KW
    Kcp = _round_up(Kc, 128)          # pad K=36 -> 128 for clean (8,128) tiles
    Cp = _round_up(Cout, 128)         # lane-dense output, sliced below

    patches_p = jnp.pad(patches, ((0, 0), (0, Kcp - Kc))).astype(jnp.bfloat16)
    w2d = conv_w.reshape(Cout, Kc).T                        # (Kc, Cout)
    w2d_p = jnp.pad(w2d, ((0, Kcp - Kc), (0, Cp - Cout))).astype(jnp.bfloat16)
    b_p = jnp.pad(conv_b.reshape(1, Cout), ((0, 0), (0, Cp - Cout)))

    y = conv_matmul_relu(patches_p, w2d_p, b_p)             # (N*OH*OW, Cp) f32
    y = y[:, :Cout]
    # back to NCHW so the .view(N, -1) flatten order matches PyTorch.
    return y.reshape(N, OH, OW, Cout).transpose(0, 3, 1, 2)


# ---------------------------------------------------------------------------
# PolicyNet forward: CNN -> flatten -> fused(Linear/ReLU, Linear/ReLU,
#                                            Linear, tanh)
# ---------------------------------------------------------------------------
def policy_net_forward(status, params):
    feat = cnn_forward(status, params["conv_w"], params["conv_b"])
    n = feat.shape[0]
    flat = feat.reshape(n, -1).astype(jnp.float32)          # status.view(N, -1)

    K = flat.shape[1]
    # K-tile for layer 1: big enough to hide DMA, small enough for 64 MiB VMEM
    # on v7x (2048 x 1024 bf16 = 4 MiB per buffer, x2 double-buffered).
    block_k = min(2048, _round_up(K, 512))
    kp = _round_up(K, block_k)

    x_bf = jnp.pad(flat, ((0, 0), (0, kp - K))).astype(jnp.bfloat16)
    w1_bf = jnp.pad(params["w1"], ((0, kp - K), (0, 0))).astype(jnp.bfloat16)
    w2_bf = params["w2"].astype(jnp.bfloat16)

    nb = params["w3"].shape[1]
    np_ = _round_up(nb, 128)                                # lane-dense final layer
    w3_bf = jnp.pad(params["w3"], ((0, 0), (0, np_ - nb))).astype(jnp.bfloat16)
    b3_p = jnp.pad(params["b3"], ((0, 0), (0, np_ - nb)))

    out = mlp_fused(x_bf, w1_bf, params["b1"], w2_bf, params["b2"],
                    w3_bf, b3_p, block_k=block_k)
    return out[:, :nb]


# ---------------------------------------------------------------------------
# Deterministic parameter init (PyTorch-like uniform(-1/sqrt(fan_in), +...)).
# ---------------------------------------------------------------------------
def init_params(key, in_channels, conv_channels, cnn_output_dim, nb_actions):
    ks = jax.random.split(key, 8)

    def uni(k, shape, fan_in):
        bound = 1.0 / float(fan_in) ** 0.5
        return jax.random.uniform(k, shape, jnp.float32, -bound, bound)

    kh = kw = 3
    conv_fan_in = in_channels * kh * kw
    return {
        "conv_w": uni(ks[0], (conv_channels, in_channels, kh, kw), conv_fan_in),
        "conv_b": uni(ks[1], (conv_channels,), conv_fan_in),
        "w1": uni(ks[2], (cnn_output_dim, 1024), cnn_output_dim),
        "b1": uni(ks[3], (1, 1024), cnn_output_dim),
        "w2": uni(ks[4], (1024, 512), 1024),
        "b2": uni(ks[5], (1, 512), 1024),
        "w3": uni(ks[6], (512, nb_actions), 512),
        "b3": uni(ks[7], (1, nb_actions), 512),
    }


if __name__ == "__main__":
    # Small shapes consistent with the module's forward:
    # batch=2, channels=4, spatial=16x16 (stands in for the 4x512x512 default).
    batch, in_channels, spatial = 2, 4, 16
    conv_channels = 8
    nb_actions = 6

    # conv(stride=2, pad=1): 16 -> 8 spatial; cnn_output_dim = 8*8*8 = 512
    oh = ow = (spatial + 2 * 1 - 3) // 2 + 1
    cnn_output_dim = conv_channels * oh * ow

    key = jax.random.PRNGKey(0)
    k_x, k_p = jax.random.split(key)
    x = jax.random.normal(k_x, (batch, in_channels, spatial, spatial), jnp.float32)
    params = init_params(k_p, in_channels, conv_channels, cnn_output_dim, nb_actions)

    fwd = jax.jit(policy_net_forward)
    out = fwd(x, params)
    out = jax.block_until_ready(out)

    assert out.shape == (batch, nb_actions), out.shape
    assert out.dtype == jnp.float32
    assert bool(jnp.all(jnp.isfinite(out)))
    assert bool(jnp.all(jnp.abs(out) <= 1.0))  # tanh-bounded
    print("KERNEL_OK")
</pallas_src>

<mosaic_0001>
module attributes {stable_mosaic.version = 11 : i64} {
  func.func @_conv_mm_kernel(%arg0: i32, %arg1: memref<128x128xbf16, #tpu.memory_space<vmem>>, %arg2: memref<128x128xbf16, #tpu.memory_space<vmem>>, %arg3: memref<1x128xf32, #tpu.memory_space<vmem>>, %arg4: memref<128x128xf32, #tpu.memory_space<vmem>>) attributes {dimension_semantics = [#tpu.dimension_semantics<parallel>], iteration_bounds = array<i64: 1>, scalar_prefetch = 0 : i64, scratch_operands = 0 : i64, tpu.core_type = #tpu.core_type<tc>, window_params = [{transform_indices = @transform_0, window_bounds = array<i64: 128, 128>}, {pipeline_mode = #tpu.pipeline_mode<synchronous>, transform_indices = @transform_1, window_bounds = array<i64: 128, 128>}, {pipeline_mode = #tpu.pipeline_mode<synchronous>, transform_indices = @transform_2, window_bounds = array<i64: 1, 128>}, {transform_indices = @transform_3, window_bounds = array<i64: 128, 128>}]} {
    %c0 = arith.constant 0 : index
    %c0_0 = arith.constant 0 : index
    %0 = vector.load %arg1[%c0, %c0_0] : memref<128x128xbf16, #tpu.memory_space<vmem>>, vector<128x128xbf16>
    %c0_1 = arith.constant 0 : index
    %c0_2 = arith.constant 0 : index
    %1 = vector.load %arg2[%c0_1, %c0_2] : memref<128x128xbf16, #tpu.memory_space<vmem>>, vector<128x128xbf16>
    %cst = arith.constant dense<0.000000e+00> : vector<128x128xf32>
    %2 = tpu.matmul %0, %1, %cst {dimension_numbers = #tpu.dot_dimension_numbers<[1], [0], [0], [1], [0, 0, 1, 1], [], []>} : vector<128x128xbf16>, vector<128x128xbf16>, vector<128x128xf32> -> vector<128x128xf32>
    %c0_3 = arith.constant 0 : index
    %c0_4 = arith.constant 0 : index
    %3 = vector.load %arg3[%c0_3, %c0_4] : memref<1x128xf32, #tpu.memory_space<vmem>>, vector<1x128xf32>
    %4 = vector.broadcast %3 : vector<1x128xf32> to vector<128x128xf32>
    %5 = arith.addf %2, %4 : vector<128x128xf32>
    %cst_5 = arith.constant 0.000000e+00 : f32
    %6 = vector.broadcast %cst_5 : f32 to vector<128x128xf32>
    %7 = arith.maximumf %5, %6 : vector<128x128xf32>
    %c0_6 = arith.constant 0 : index
    %c0_7 = arith.constant 0 : index
    %8 = vector.load %arg4[%c0_6, %c0_7] : memref<128x128xf32, #tpu.memory_space<vmem>>, vector<128x128xf32>
    tpu.vector_store %arg4[%c0_6, %c0_7], %7 {strides = array<i32>} : memref<128x128xf32, #tpu.memory_space<vmem>>, vector<128x128xf32>,
    return
  }
  func.func @transform_0(%arg0: i32) -> (i32, i32) {
    %c0_i32 = arith.constant 0 : i32
    %c0_i32_0 = arith.constant 0 : i32
    return %arg0, %c0_i32 : i32, i32
  }
  func.func @transform_1(%arg0: i32) -> (i32, i32) {
    %c0_i32 = arith.constant 0 : i32
    %c0_i32_0 = arith.constant 0 : i32
    %c0_i32_1 = arith.constant 0 : i32
    return %c0_i32, %c0_i32_0 : i32, i32
  }
  func.func @transform_2(%arg0: i32) -> (i32, i32) {
    %c0_i32 = arith.constant 0 : i32
    %c0_i32_0 = arith.constant 0 : i32
    %c0_i32_1 = arith.constant 0 : i32
    return %c0_i32, %c0_i32_0 : i32, i32
  }
  func.func @transform_3(%arg0: i32) -> (i32, i32) {
    %c0_i32 = arith.constant 0 : i32
    %c0_i32_0 = arith.constant 0 : i32
    return %arg0, %c0_i32 : i32, i32
  }
}

module attributes {stable_mosaic.version = 11 : i64} {
  func.func @_mlp_fused_kernel(%arg0: i32, %arg1: memref<2x512xbf16, #tpu.memory_space<vmem>>, %arg2: memref<512x1024xbf16, #tpu.memory_space<vmem>>, %arg3: memref<1x1024xf32, #tpu.memory_space<vmem>>, %arg4: memref<1024x512xbf16, #tpu.memory_space<vmem>>, %arg5: memref<1x512xf32, #tpu.memory_space<vmem>>, %arg6: memref<512x128xbf16, #tpu.memory_space<vmem>>, %arg7: memref<1x128xf32, #tpu.memory_space<vmem>>, %arg8: memref<2x128xf32, #tpu.memory_space<vmem>>, %arg9: memref<2x1024xf32, #tpu.memory_space<vmem>>) attributes {dimension_semantics = [#tpu.dimension_semantics<arbitrary>], iteration_bounds = array<i64: 1>, scalar_prefetch = 0 : i64, scratch_operands = 1 : i64, tpu.core_type = #tpu.core_type<tc>, window_params = [{transform_indices = @transform_0, window_bounds = array<i64: 2, 512>}, {transform_indices = @transform_1, window_bounds = array<i64: 512, 1024>}, {pipeline_mode = #tpu.pipeline_mode<synchronous>, transform_indices = @transform_2, window_bounds = array<i64: 1, 1024>}, {pipeline_mode = #tpu.pipeline_mode<synchronous>, transform_indices = @transform_3, window_bounds = array<i64: 1024, 512>}, {pipeline_mode = #tpu.pipeline_mode<synchronous>, transform_indices = @transform_4, window_bounds = array<i64: 1, 512>}, {pipeline_mode = #tpu.pipeline_mode<synchronous>, transform_indices = @transform_5, window_bounds = array<i64: 512, 128>}, {pipeline_mode = #tpu.pipeline_mode<synchronous>, transform_indices = @transform_6, window_bounds = array<i64: 1, 128>}, {pipeline_mode = #tpu.pipeline_mode<synchronous>, transform_indices = @transform_7, window_bounds = array<i64: 2, 128>}]} {
    %c0_i32 = arith.constant 0 : i32
    %0 = arith.cmpi eq, %arg0, %c0_i32 : i32
    %1 = arith.extui %0 : i1 to i32
    %c0_i32_0 = arith.constant 0 : i32
    %2 = arith.cmpi ne, %1, %c0_i32_0 : i32
    scf.if %2 {
      %cst_10 = arith.constant 0.000000e+00 : f32
      %12 = vector.broadcast %cst_10 : f32 to vector<2x1024xf32>
      %c0_11 = arith.constant 0 : index
      %c0_12 = arith.constant 0 : index
      %13 = vector.load %arg9[%c0_11, %c0_12] : memref<2x1024xf32, #tpu.memory_space<vmem>>, vector<2x1024xf32>
      tpu.vector_store %arg9[%c0_11, %c0_12], %12 {strides = array<i32>} : memref<2x1024xf32, #tpu.memory_space<vmem>>, vector<2x1024xf32>,
    } else {
    }
    %c0 = arith.constant 0 : index
    %c0_1 = arith.constant 0 : index
    %3 = vector.load %arg9[%c0, %c0_1] : memref<2x1024xf32, #tpu.memory_space<vmem>>, vector<2x1024xf32>
    %c0_2 = arith.constant 0 : index
    %c0_3 = arith.constant 0 : index
    %4 = vector.load %arg1[%c0_2, %c0_3] : memref<2x512xbf16, #tpu.memory_space<vmem>>, vector<2x512xbf16>
    %c0_4 = arith.constant 0 : index
    %c0_5 = arith.constant 0 : index
    %5 = vector.load %arg2[%c0_4, %c0_5] : memref<512x1024xbf16, #tpu.memory_space<vmem>>, vector<512x1024xbf16>
    %cst = arith.constant dense<0.000000e+00> : vector<2x1024xf32>
    %6 = tpu.matmul %4, %5, %cst {dimension_numbers = #tpu.dot_dimension_numbers<[1], [0], [0], [1], [0, 0, 1, 1], [], []>} : vector<2x512xbf16>, vector<512x1024xbf16>, vector<2x1024xf32> -> vector<2x1024xf32>
    %7 = arith.addf %3, %6 : vector<2x1024xf32>
    %c0_6 = arith.constant 0 : index
    %c0_7 = arith.constant 0 : index
    %8 = vector.load %arg9[%c0_6, %c0_7] : memref<2x1024xf32, #tpu.memory_space<vmem>>, vector<2x1024xf32>
    tpu.vector_store %arg9[%c0_6, %c0_7], %7 {strides = array<i32>} : memref<2x1024xf32, #tpu.memory_space<vmem>>, vector<2x1024xf32>,
    %c0_i32_8 = arith.constant 0 : i32
    %9 = arith.cmpi eq, %arg0, %c0_i32_8 : i32
    %10 = arith.extui %9 : i1 to i32
    %c0_i32_9 = arith.constant 0 : i32
    %11 = arith.cmpi ne, %10, %c0_i32_9 : i32
    scf.if %11 {
      %c0_10 = arith.constant 0 : index
      %c0_11 = arith.constant 0 : index
      %12 = vector.load %arg9[%c0_10, %c0_11] : memref<2x1024xf32, #tpu.memory_space<vmem>>, vector<2x1024xf32>
      %c0_12 = arith.constant 0 : index
      %c0_13 = arith.constant 0 : index
      %13 = vector.load %arg3[%c0_12, %c0_13] : memref<1x1024xf32, #tpu.memory_space<vmem>>, vector<1x1024xf32>
      %14 = vector.broadcast %13 : vector<1x1024xf32> to vector<2x1024xf32>
      %15 = arith.addf %12, %14 : vector<2x1024xf32>
      %cst_14 = arith.constant 0.000000e+00 : f32
      %16 = vector.broadcast %cst_14 : f32 to vector<2x1024xf32>
      %17 = arith.maximumf %15, %16 : vector<2x1024xf32>
      %18 = arith.truncf %17 : vector<2x1024xf32> to vector<2x1024xbf16>
      %c0_15 = arith.constant 0 : index
      %c0_16 = arith.constant 0 : index
      %19 = vector.load %arg4[%c0_15, %c0_16] : memref<1024x512xbf16, #tpu.memory_space<vmem>>, vector<1024x512xbf16>
      %cst_17 = arith.constant dense<0.000000e+00> : vector<2x512xf32>
      %20 = tpu.matmul %18, %19, %cst_17 {dimension_numbers = #tpu.dot_dimension_numbers<[1], [0], [0], [1], [0, 0, 1, 1], [], []>} : vector<2x1024xbf16>, vector<1024x512xbf16>, vector<2x512xf32> -> vector<2x512xf32>
      %c0_18 = arith.constant 0 : index
      %c0_19 = arith.constant 0 : index
      %21 = vector.load %arg5[%c0_18, %c0_19] : memref<1x512xf32, #tpu.memory_space<vmem>>, vector<1x512xf32>
      %22 = vector.broadcast %21 : vector<1x512xf32> to vector<2x512xf32>
      %23 = arith.addf %20, %22 : vector<2x512xf32>
      %cst_20 = arith.constant 0.000000e+00 : f32
      %24 = vector.broadcast %cst_20 : f32 to vector<2x512xf32>
      %25 = arith.maximumf %23, %24 : vector<2x512xf32>
      %26 = arith.truncf %25 : vector<2x512xf32> to vector<2x512xbf16>
      %c0_21 = arith.constant 0 : index
      %c0_22 = arith.constant 0 : index
      %27 = vector.load %arg6[%c0_21, %c0_22] : memref<512x128xbf16, #tpu.memory_space<vmem>>, vector<512x128xbf16>
      %cst_23 = arith.constant dense<0.000000e+00> : vector<2x128xf32>
      %28 = tpu.matmul %26, %27, %cst_23 {dimension_numbers = #tpu.dot_dimension_numbers<[1], [0], [0], [1], [0, 0, 1, 1], [], []>} : vector<2x512xbf16>, vector<512x128xbf16>, vector<2x128xf32> -> vector<2x128xf32>
      %c0_24 = arith.constant 0 : index
      %c0_25 = arith.constant 0 : index
      %29 = vector.load %arg7[%c0_24, %c0_25] : memref<1x128xf32, #tpu.memory_space<vmem>>, vector<1x128xf32>
      %30 = vector.broadcast %29 : vector<1x128xf32> to vector<2x128xf32>
      %31 = arith.addf %28, %30 : vector<2x128xf32>
      %32 = math.tanh %31 : vector<2x128xf32>
      %c0_26 = arith.constant 0 : index
      %c0_27 = arith.constant 0 : index
      %33 = vector.load %arg8[%c0_26, %c0_27] : memref<2x128xf32, #tpu.memory_space<vmem>>, vector<2x128xf32>
      tpu.vector_store %arg8[%c0_26, %c0_27], %32 {strides = array<i32>} : memref<2x128xf32, #tpu.memory_space<vmem>>, vector<2x128xf32>,
    } else {
    }
    return
  }
  func.func @transform_0(%arg0: i32) -> (i32, i32) {
    %c0_i32 = arith.constant 0 : i32
    %c0_i32_0 = arith.constant 0 : i32
    return %c0_i32, %arg0 : i32, i32
  }
  func.func @transform_1(%arg0: i32) -> (i32, i32) {
    %c0_i32 = arith.constant 0 : i32
    %c0_i32_0 = arith.constant 0 : i32
    return %arg0, %c0_i32 : i32, i32
  }
  func.func @transform_2(%arg0: i32) -> (i32, i32) {
    %c0_i32 = arith.constant 0 : i32
    %c0_i32_0 = arith.constant 0 : i32
    %c0_i32_1 = arith.constant 0 : i32
    return %c0_i32, %c0_i32_0 : i32, i32
  }
  func.func @transform_3(%arg0: i32) -> (i32, i32) {
    %c0_i32 = arith.constant 0 : i32
    %c0_i32_0 = arith.constant 0 : i32
    %c0_i32_1 = arith.constant 0 : i32
    return %c0_i32, %c0_i32_0 : i32, i32
  }
  func.func @transform_4(%arg0: i32) -> (i32, i32) {
    %c0_i32 = arith.constant 0 : i32
    %c0_i32_0 = arith.constant 0 : i32
    %c0_i32_1 = arith.constant 0 : i32
    return %c0_i32, %c0_i32_0 : i32, i32
  }
  func.func @transform_5(%arg0: i32) -> (i32, i32) {
    %c0_i32 = arith.constant 0 : i32
    %c0_i32_0 = arith.constant 0 : i32
    %c0_i32_1 = arith.constant 0 : i32
    return %c0_i32, %c0_i32_0 : i32, i32
  }
  func.func @transform_6(%arg0: i32) -> (i32, i32) {
    %c0_i32 = arith.constant 0 : i32
    %c0_i32_0 = arith.constant 0 : i32
    %c0_i32_1 = arith.constant 0 : i32
    return %c0_i32, %c0_i32_0 : i32, i32
  }
  func.func @transform_7(%arg0: i32) -> (i32, i32) {
    %c0_i32 = arith.constant 0 : i32
    %c0_i32_0 = arith.constant 0 : i32
    %c0_i32_1 = arith.constant 0 : i32
    return %c0_i32, %c0_i32_0 : i32, i32
  }
}

</mosaic_0001>

<bundles_post_ra>
// kernel: policy_net_forward.2
= control target key start
LH: loop header
LB: loop body
LE: loop exit
PB: predicated region body
PF: predicated region fallthrough
CT: control target
= control target key end

     0   :  { %s499_s1 = inlined_call_operand.vmem [shape: bf16[128,128], index: 1, kind: input, shape index: {}]   ;;  %s500_s0 = inlined_call_operand.vmem [shape: bf16[128,128], index: 0, kind: input, shape index: {}]   ;;  %s501_s2 = inlined_call_operand.vmem [shape: f32[1,128], index: 2, kind: input, shape index: {}]   ;;  %s502_s3 = inlined_call_operand.vmem [shape: f32[128,128], index: 3, kind: output, shape index: {}]  }
   0x1   :  { %v364_v0 = vld [vmem:[%s499_s1] sm:$0xff]   ;;  %v365_v1 = vld [vmem:[%s499_s1 + $0x8] sm:$0xff]   ;;  %v366_v2 = vld [vmem:[%s499_s1 + $0x10] sm:$0xff]  }
   0x2   :  { %316 = vmatprep.subr.bf16.mxu0 %v364_v0  ;;  %348 = vmatprep.subr.bf16.mxu1 %v364_v0  ;;  %v367_v3 = vld [vmem:[%s499_s1 + $0x18] sm:$0xff]   ;;  %v372_v4 = vld [vmem:[%s500_s0] sm:$0xff]   ;;  %v369_v7 = vld [vmem:[%s499_s1 + $0x28] sm:$0xff]  }
   0x3   :  { %317 = vmatpush3.bf16.msra.mxu0 %v364_v0  ;;  %356 = vmatpush3.bf16.msra.mxu1 %v364_v0  ;;  %v373_v5 = vld [vmem:[%s500_s0 + $0x20] sm:$0xff]   ;;  %v370_v8 = vld [vmem:[%s499_s1 + $0x30] sm:$0xff]   ;;  %v371_v9 = vld [vmem:[%s499_s1 + $0x38] sm:$0xff]  }
   0x4   :  { %318 = vmatprep.subr.bf16.mxu0 %v365_v1  ;;  %349 = vmatprep.subr.bf16.mxu1 %v365_v1  ;;  %v368_v6 = vld [vmem:[%s499_s1 + $0x20] sm:$0xff]   ;;  %v374_v10 = vld [vmem:[%s500_s0 + $0x8] sm:$0xff]   ;;  %v376_v12 = vld [vmem:[%s500_s0 + $0x10] sm:$0xff]  }
   0x5   :  { %332 = vmatprep.mubr.bf16.mxu0 %v372_v4  ;;  %340 = vmatprep.mubr.bf16.mxu1 %v373_v5  ;;  %v375_v11 = vld [vmem:[%s500_s0 + $0x28] sm:$0xff]   ;;  %v377_v13 = vld [vmem:[%s500_s0 + $0x30] sm:$0xff]   ;;  %v378_v14 = vld [vmem:[%s500_s0 + $0x18] sm:$0xff]  }
   0x6   :  { %v379_v15 = vld [vmem:[%s500_s0 + $0x38] sm:$0xff]   ;;  %v283_v16 = vld [vmem:[%s501_s2] ss:$0 sm:$0xff] }
   0x7   :  { %319 = vmatpush3.bf16.msra.mxu0 %v365_v1  ;;  %357 = vmatpush3.bf16.msra.mxu1 %v365_v1 }
   0x8   :  { %320 = vmatprep.subr.bf16.mxu0 %v366_v2  ;;  %350 = vmatprep.subr.bf16.mxu1 %v366_v2 }
   0xb   :  { %321 = vmatpush3.bf16.msra.mxu0 %v366_v2  ;;  %358 = vmatpush3.bf16.msra.mxu1 %v366_v2 }
   0xc   :  { %322 = vmatprep.subr.bf16.mxu0 %v367_v3  ;;  %351 = vmatprep.subr.bf16.mxu1 %v367_v3 }
   0xf   :  { %323 = vmatpush3.bf16.msra.mxu0 %v367_v3  ;;  %359 = vmatpush3.bf16.msra.mxu1 %v367_v3 }
  0x10   :  { %324 = vmatprep.subr.bf16.mxu0 %v368_v6  ;;  %352 = vmatprep.subr.bf16.mxu1 %v368_v6 }
  0x13   :  { %325 = vmatpush3.bf16.msra.mxu0 %v368_v6  ;;  %360 = vmatpush3.bf16.msra.mxu1 %v368_v6 }
  0x14   :  { %326 = vmatprep.subr.bf16.mxu0 %v369_v7  ;;  %353 = vmatprep.subr.bf16.mxu1 %v369_v7 }
  0x17   :  { %327 = vmatpush3.bf16.msra.mxu0 %v369_v7  ;;  %361 = vmatpush3.bf16.msra.mxu1 %v369_v7 }
  0x18   :  { %328 = vmatprep.subr.bf16.mxu0 %v370_v8  ;;  %354 = vmatprep.subr.bf16.mxu1 %v370_v8 }
  0x1b   :  { %329 = vmatpush3.bf16.msra.mxu0 %v370_v8  ;;  %362 = vmatpush3.bf16.msra.mxu1 %v370_v8 }
  0x1c   :  { %330 = vmatprep.subr.bf16.mxu0 %v371_v9  ;;  %355 = vmatprep.subr.bf16.mxu1 %v371_v9 }
  0x1f   :  { %331 = vmatpush3.bf16.msra.mxu0 %v371_v9  ;;  %363 = vmatpush3.bf16.msra.mxu1 %v371_v9 }
  0x22   :  { %333 = vmatmul.mubr.bf16.vlgmr.msra.gmra.mrb[0].mxu0 %v374_v10  ;;  %341 = vmatmul.mubr.bf16.vlgmr.msra.gmra.mrb[0].mxu1 %v375_v11 }
  0x23   :  { %336 = vmatprep.mubr.bf16.mxu0 %v376_v12  ;;  %344 = vmatprep.mubr.bf16.mxu1 %v377_v13 }
  0x2a   :  { %337 = vmatmul.mubr.bf16.gmra.mrb[4].mxu0 %v378_v14  ;;  %345 = vmatmul.mubr.bf16.gmra.mrb[4].mxu1 %v379_v15 }
  0xf5   :  { %v334_v17 = vpop.f32.mrb[0].mxu0  ;;  %v342_v18 = vpop.f32.mrb[0].mxu1 }
  0xf6   :  { %v193_v19 = vadd.f32 %v334_v17, %v283_v16  ;;  %v225_v20 = vadd.f32 %v342_v18, %v283_v16  ;;  %v184_v21 = vpop.f32.mrb[1].mxu0  ;;  %v216_v22 = vpop.f32.mrb[1].mxu1 }
  0xf7   :  { %v185_v23 = vadd.f32 %v283_v16, %v184_v21  ;;  %v217_v24 = vadd.f32 %v283_v16, %v216_v22  ;;  %v335_v25 = vpop.f32.mrb[2].mxu0  ;;  %v343_v26 = vpop.f32.mrb[2].mxu1 }
  0xf8   :  { %v249_v27 = vmax.f32 %v193_v19, 0.0  ;;  %v257_v28 = vmax.f32 %v225_v20, 0.0  ;;  %v196_v29 = vadd.f32 %v335_v25, %v283_v16  ;;  %v228_v30 = vadd.f32 %v343_v26, %v283_v16  ;;  %v187_v31 = vpop.f32.mrb[3].mxu0  ;;  %v219_v32 = vpop.f32.mrb[3].mxu1 }
  0xf9   :  { %v247_v33 = vmax.f32 %v185_v23, 0.0  ;;  %v255_v34 = vmax.f32 %v217_v24, 0.0  ;;  %v188_v35 = vadd.f32 %v283_v16, %v187_v31  ;;  %v220_v36 = vadd.f32 %v283_v16, %v219_v32 }
  0xfa   :  { %265 = vst [vmem:[%s502_s3 + $0x10] sm:$0xff] %v249_v27  ;;  %273 = vst [vmem:[%s502_s3 + $0x50] sm:$0xff] %v257_v28  ;;  %v250_v37 = vmax.f32 %v196_v29, 0.0  ;;  %v258_v38 = vmax.f32 %v228_v30, 0.0 }
  0xfb   :  { %263 = vst [vmem:[%s502_s3] sm:$0xff] %v247_v33  ;;  %271 = vst [vmem:[%s502_s3 + $0x40] sm:$0xff] %v255_v34  ;;  %v248_v39 = vmax.f32 %v188_v35, 0.0  ;;  %v256_v40 = vmax.f32 %v220_v36, 0.0 }
  0xfc   :  { %266 = vst [vmem:[%s502_s3 + $0x18] sm:$0xff] %v250_v37  ;;  %274 = vst [vmem:[%s502_s3 + $0x58] sm:$0xff] %v258_v38 }
  0xfd   :  { %264 = vst [vmem:[%s502_s3 + $0x8] sm:$0xff] %v248_v39  ;;  %272 = vst [vmem:[%s502_s3 + $0x48] sm:$0xff] %v256_v40  ;;  %v338_v41 = vpop.f32.mrb[4].mxu0  ;;  %v346_v42 = vpop.f32.mrb[4].mxu1 }
  0xfe   :  { %v209_v43 = vadd.f32 %v338_v41, %v283_v16  ;;  %v241_v44 = vadd.f32 %v346_v42, %v283_v16  ;;  %v200_v45 = vpop.f32.mrb[5].mxu0  ;;  %v232_v46 = vpop.f32.mrb[5].mxu1 }
  0xff   :  { %v201_v47 = vadd.f32 %v283_v16, %v200_v45  ;;  %v233_v48 = vadd.f32 %v283_v16, %v232_v46  ;;  %v339_v49 = vpop.f32.mrb[6].mxu0  ;;  %v347_v50 = vpop.f32.mrb[6].mxu1 }
 0x100   :  { %v253_v51 = vmax.f32 %v209_v43, 0.0  ;;  %v261_v52 = vmax.f32 %v241_v44, 0.0  ;;  %v212_v53 = vadd.f32 %v339_v49, %v283_v16  ;;  %v244_v54 = vadd.f32 %v347_v50, %v283_v16  ;;  %v203_v55 = vpop.f32.mrb[7].mxu0  ;;  %v235_v56 = vpop.f32.mrb[7].mxu1 }
 0x101   :  { %v251_v57 = vmax.f32 %v201_v47, 0.0  ;;  %v259_v58 = vmax.f32 %v233_v48, 0.0  ;;  %v204_v59 = vadd.f32 %v283_v16, %v203_v55  ;;  %v236_v60 = vadd.f32 %v283_v16, %v235_v56 }
 0x102   :  { %269 = vst [vmem:[%s502_s3 + $0x30] sm:$0xff] %v253_v51  ;;  %277 = vst [vmem:[%s502_s3 + $0x70] sm:$0xff] %v261_v52  ;;  %v254_v61 = vmax.f32 %v212_v53, 0.0  ;;  %v262_v62 = vmax.f32 %v244_v54, 0.0 }
 0x103   :  { %267 = vst [vmem:[%s502_s3 + $0x20] sm:$0xff] %v251_v57  ;;  %275 = vst [vmem:[%s502_s3 + $0x60] sm:$0xff] %v259_v58  ;;  %v252_v63 = vmax.f32 %v204_v59, 0.0  ;;  %v260_v0 = vmax.f32 %v236_v60, 0.0 }
 0x104   :  { %270 = vst [vmem:[%s502_s3 + $0x38] sm:$0xff] %v254_v61  ;;  %278 = vst [vmem:[%s502_s3 + $0x78] sm:$0xff] %v262_v62 }
 0x105   :  { %268 = vst [vmem:[%s502_s3 + $0x28] sm:$0xff] %v252_v63  ;;  %276 = vst [vmem:[%s502_s3 + $0x68] sm:$0xff] %v260_v0 }

// kernel: policy_net_forward.3
= control target key start
LH: loop header
LB: loop body
LE: loop exit
PB: predicated region body
PF: predicated region fallthrough
CT: control target
= control target key end

     0   :  { %v5441_v35 = vmov 1966171168   ;;  %v305_v37 = vlaneseq  ;;  %s7241_s0 = inlined_call_operand.vmem [shape: bf16[2,512], index: 0, kind: input, shape index: {}]   ;;  %s7242_s1 = inlined_call_operand.vmem [shape: bf16[512,1024], index: 1, kind: input, shape index: {}]   ;;  %s7243_s2 = inlined_call_operand.vmem [shape: f32[1,1024], index: 2, kind: input, shape index: {}]   ;;  %s7244_s3 = inlined_call_operand.vmem [shape: bf16[1024,512], index: 3, kind: input, shape index: {}]   ;;  %s7245_s4 = inlined_call_operand.vmem [shape: f32[1,512], index: 4, kind: input, shape index: {}]   ;;  %s7246_s5 = inlined_call_operand.vmem [shape: bf16[512,128], index: 5, kind: input, shape index: {}]   ;;  %s7247_s6 = inlined_call_operand.vmem [shape: f32[1,128], index: 6, kind: input, shape index: {}]   ;;  %s7248_s7 = inlined_call_operand.hbm [shape: f32[2,128], index: 7, kind: output, shape index: {}]  }
   0x1   :  { %v37_v0 = vld [vmem:[%s7242_s1] sm:$0xff]  ;;  %v38_v2 = vld [vmem:[%s7242_s1 + $0x8] sm:$0xff]  ;;  %v303_v36 = vunpack.c.l.s4 %v5441_v35 }
   0x2   :  { %v41_v1 = vld [vmem:[%s7242_s1 + $0x20] sm:$0xff]  ;;  %v42_v4 = vld [vmem:[%s7242_s1 + $0x28] sm:$0xff]  ;;  %v5556_v47 = vshrl.u32 %v305_v37, 7 }
   0x3   :  { %v4364_v3 = vcombine.high %v37_v0, %v41_v1  ;;  %v4363_v5 = vcombine.low %v37_v0, %v41_v1  ;;  %v45_v6 = vld [vmem:[%s7242_s1 + $0x40] sm:$0xff]  ;;  %v4366_v8 = vcombine.high %v38_v2, %v42_v4  ;;  %v4365_v9 = vcombine.low %v38_v2, %v42_v4  ;;  %v46_v11 = vld [vmem:[%s7242_s1 + $0x48] sm:$0xff] }
   0x4   :  { %v49_v7 = vld [vmem:[%s7242_s1 + $0x60] sm:$0xff]  ;;  %v50_v12 = vld [vmem:[%s7242_s1 + $0x68] sm:$0xff]  ;;  %v304_v46 = vunpack.c.0.s8 %v303_v36 }
   0x5   :  { %v4372_v10 = vcombine.high %v45_v6, %v49_v7  ;;  %v53_v13 = vld [vmem:[%s7242_s1 + $0x80] sm:$0xff]  ;;  %1602 = vmatprep.subr.bf16.mxu0 %v4364_v3  ;;  %v4374_v14 = vcombine.high %v46_v11, %v50_v12  ;;  %v54_v16 = vld [vmem:[%s7242_s1 + $0x88] sm:$0xff]  ;;  %1684 = vmatprep.subr.bf16.mxu1 %v4366_v8  ;;  %v4371_v18 = vcombine.low %v45_v6, %v49_v7 }
   0x6   :  { %v57_v15 = vld [vmem:[%s7242_s1 + $0xa0] sm:$0xff]  ;;  %v58_v17 = vld [vmem:[%s7242_s1 + $0xa8] sm:$0xff]  ;;  %1603 = vmatpush1.bf16.msra.mxu0 %v4363_v5  ;;  %1685 = vmatpush1.bf16.msra.mxu1 %v4365_v9  ;;  %v4373_v19 = vcombine.low %v46_v11, %v50_v12  ;;  %v5571_v56 = vsub.s32 %v304_v46, %v5556_v47 }
   0x7   :  { %1604 = vmatprep.subr.bf16.mxu0 %v4372_v10  ;;  %v4380_v20 = vcombine.high %v53_v13, %v57_v15  ;;  %1686 = vmatprep.subr.bf16.mxu1 %v4374_v14  ;;  %v4382_v21 = vcombine.high %v54_v16, %v58_v17  ;;  %v61_v22 = vld [vmem:[%s7242_s1 + $0xc0] sm:$0xff]  ;;  %v62_v24 = vld [vmem:[%s7242_s1 + $0xc8] sm:$0xff]  ;;  %v4379_v26 = vcombine.low %v53_v13, %v57_v15 }
   0x8   :  { %v65_v23 = vld [vmem:[%s7242_s1 + $0xe0] sm:$0xff]  ;;  %v66_v25 = vld [vmem:[%s7242_s1 + $0xe8] sm:$0xff]  ;;  %v4381_v27 = vcombine.low %v54_v16, %v58_v17 }
   0x9   :  { %v4388_v28 = vcombine.high %v61_v22, %v65_v23  ;;  %v4390_v29 = vcombine.high %v62_v24, %v66_v25  ;;  %v69_v30 = vld [vmem:[%s7242_s1 + $0x100] sm:$0xff]  ;;  %v70_v32 = vld [vmem:[%s7242_s1 + $0x108] sm:$0xff]  ;;  %v4387_v34 = vcombine.low %v61_v22, %v65_v23  ;;  %v4389_v38 = vcombine.low %v62_v24, %v66_v25 }
   0xa   :  { %1605 = vmatpush1.bf16.msra.mxu0 %v4371_v18  ;;  %1687 = vmatpush1.bf16.msra.mxu1 %v4373_v19  ;;  %v73_v31 = vld [vmem:[%s7242_s1 + $0x120] sm:$0xff]  ;;  %v74_v33 = vld [vmem:[%s7242_s1 + $0x128] sm:$0xff] }
   0xb   :  { %1606 = vmatprep.subr.bf16.mxu0 %v4380_v20  ;;  %1688 = vmatprep.subr.bf16.mxu1 %v4382_v21  ;;  %v4396_v39 = vcombine.high %v69_v30, %v73_v31  ;;  %v4398_v40 = vcombine.high %v70_v32, %v74_v33  ;;  %v77_v41 = vld [vmem:[%s7242_s1 + $0x140] sm:$0xff]  ;;  %v78_v43 = vld [vmem:[%s7242_s1 + $0x148] sm:$0xff]  ;;  %v4395_v45 = vcombine.low %v69_v30, %v73_v31 }
   0xc   :  { %v81_v42 = vld [vmem:[%s7242_s1 + $0x160] sm:$0xff]  ;;  %v82_v44 = vld [vmem:[%s7242_s1 + $0x168] sm:$0xff]  ;;  %v4397_v48 = vcombine.low %v70_v32, %v74_v33 }
   0xd   :  { %v4404_v49 = vcombine.high %v77_v41, %v81_v42  ;;  %v4406_v50 = vcombine.high %v78_v43, %v82_v44  ;;  %v85_v51 = vld [vmem:[%s7242_s1 + $0x180] sm:$0xff]  ;;  %v86_v53 = vld [vmem:[%s7242_s1 + $0x188] sm:$0xff]  ;;  %v4403_v55 = vcombine.low %v77_v41, %v81_v42  ;;  %v4405_v57 = vcombine.low %v78_v43, %v82_v44 }
   0xe   :  { %1607 = vmatpush1.bf16.msra.mxu0 %v4379_v26  ;;  %1689 = vmatpush1.bf16.msra.mxu1 %v4381_v27  ;;  %v89_v52 = vld [vmem:[%s7242_s1 + $0x1a0] sm:$0xff]  ;;  %v90_v54 = vld [vmem:[%s7242_s1 + $0x1a8] sm:$0xff] }
   0xf   :  { %1608 = vmatprep.subr.bf16.mxu0 %v4388_v28  ;;  %1690 = vmatprep.subr.bf16.mxu1 %v4390_v29  ;;  %v4412_v58 = vcombine.high %v85_v51, %v89_v52  ;;  %v5576_v59 = vld.sshfl [vmem:[%s7241_s0] sm:$0x33 pattern:$0x75316420]  ;;  %v4414_v60 = vcombine.high %v86_v53, %v90_v54  ;;  %v94_v0 = vld [vmem:[%s7242_s1 + $0x1c8] sm:$0xff]  ;;  %v4411_v2 = vcombine.low %v85_v51, %v89_v52 }
  0x10   :  { %v93_v61 = vld [vmem:[%s7242_s1 + $0x1c0] sm:$0xff]  ;;  %v301_v63 = vcombine.high %v5576_v59, %v5576_v59  ;;  %v98_v1 = vld [vmem:[%s7242_s1 + $0x1e8] sm:$0xff]  ;;  %v4413_v4 = vcombine.low %v86_v53, %v90_v54 }
  0x11   :  { %v97_v62 = vld [vmem:[%s7242_s1 + $0x1e0] sm:$0xff]  ;;  %v4422_v6 = vcombine.high %v94_v0, %v98_v1  ;;  %v102_v9 = vld [vmem:[%s7242_s1 + $0x208] sm:$0xff]  ;;  %v4421_v12 = vcombine.low %v94_v0, %v98_v1 }
  0x12   :  { %1609 = vmatpush1.bf16.msra.mxu0 %v4387_v34  ;;  %1691 = vmatpush1.bf16.msra.mxu1 %v4389_v38  ;;  %v5593_v3 = vrot.slane %v301_v63, %v5571_v56  ;;  %v4420_v5 = vcombine.high %v93_v61, %v97_v62  ;;  %v101_v7 = vld [vmem:[%s7242_s1 + $0x200] sm:$0xff]  ;;  %v106_v10 = vld [vmem:[%s7242_s1 + $0x228] sm:$0xff]  ;;  %v4419_v11 = vcombine.low %v93_v61, %v97_v62 }
  0x13   :  { %1610 = vmatprep.subr.bf16.mxu0 %v4396_v39  ;;  %1692 = vmatprep.subr.bf16.mxu1 %v4398_v40  ;;  %v105_v8 = vld [vmem:[%s7242_s1 + $0x220] sm:$0xff]  ;;  %v4430_v14 = vcombine.high %v102_v9, %v106_v10  ;;  %v110_v17 = vld [vmem:[%s7242_s1 + $0x248] sm:$0xff]  ;;  %v4429_v20 = vcombine.low %v102_v9, %v106_v10 }
  0x14   :  { %1634 = vmatprep.mubr.bf16.mxu0 %v5593_v3  ;;  %1716 = vmatprep.mubr.bf16.mxu1 %v5593_v3  ;;  %v4428_v13 = vcombine.high %v101_v7, %v105_v8  ;;  %v109_v15 = vld [vmem:[%s7242_s1 + $0x240] sm:$0xff]  ;;  %v114_v18 = vld [vmem:[%s7242_s1 + $0x268] sm:$0xff]  ;;  %v4427_v19 = vcombine.low %v101_v7, %v105_v8 }
  0x15   :  { %v113_v16 = vld [vmem:[%s7242_s1 + $0x260] sm:$0xff]  ;;  %v4438_v22 = vcombine.high %v110_v17, %v114_v18  ;;  %v118_v25 = vld [vmem:[%s7242_s1 + $0x288] sm:$0xff]  ;;  %v4437_v28 = vcombine.low %v110_v17, %v114_v18 }
  0x16   :  { %1611 = vmatpush1.bf16.msra.mxu0 %v4395_v45  ;;  %1693 = vmatpush1.bf16.msra.mxu1 %v4397_v48  ;;  %v4436_v21 = vcombine.high %v109_v15, %v113_v16  ;;  %v117_v23 = vld [vmem:[%s7242_s1 + $0x280] sm:$0xff]  ;;  %v122_v26 = vld [vmem:[%s7242_s1 + $0x2a8] sm:$0xff]  ;;  %v4435_v27 = vcombine.low %v109_v15, %v113_v16 }
  0x17   :  { %1612 = vmatprep.subr.bf16.mxu0 %v4404_v49  ;;  %1694 = vmatprep.subr.bf16.mxu1 %v4406_v50  ;;  %v121_v24 = vld [vmem:[%s7242_s1 + $0x2a0] sm:$0xff]  ;;  %v4446_v30 = vcombine.high %v118_v25, %v122_v26  ;;  %v126_v33 = vld [vmem:[%s7242_s1 + $0x2c8] sm:$0xff]  ;;  %v4445_v36 = vcombine.low %v118_v25, %v122_v26 }
  0x18   :  { %v4444_v29 = vcombine.high %v117_v23, %v121_v24  ;;  %v125_v31 = vld [vmem:[%s7242_s1 + $0x2c0] sm:$0xff]  ;;  %v130_v34 = vld [vmem:[%s7242_s1 + $0x2e8] sm:$0xff]  ;;  %v4443_v35 = vcombine.low %v117_v23, %v121_v24 }
  0x19   :  { %v129_v32 = vld [vmem:[%s7242_s1 + $0x2e0] sm:$0xff]  ;;  %v4454_v38 = vcombine.high %v126_v33, %v130_v34  ;;  %v134_v41 = vld [vmem:[%s7242_s1 + $0x308] sm:$0xff]  ;;  %v4453_v44 = vcombine.low %v126_v33, %v130_v34 }
  0x1a   :  { %1613 = vmatpush1.bf16.msra.mxu0 %v4403_v55  ;;  %1695 = vmatpush1.bf16.msra.mxu1 %v4405_v57  ;;  %v4452_v37 = vcombine.high %v125_v31, %v129_v32  ;;  %v133_v39 = vld [vmem:[%s7242_s1 + $0x300] sm:$0xff]  ;;  %v138_v42 = vld [vmem:[%s7242_s1 + $0x328] sm:$0xff]  ;;  %v4451_v43 = vcombine.low %v125_v31, %v129_v32 }
  0x1b   :  { %1614 = vmatprep.subr.bf16.mxu0 %v4412_v58  ;;  %1696 = vmatprep.subr.bf16.mxu1 %v4414_v60  ;;  %v137_v40 = vld [vmem:[%s7242_s1 + $0x320] sm:$0xff]  ;;  %v4462_v46 = vcombine.high %v134_v41, %v138_v42  ;;  %v142_v50 = vld [vmem:[%s7242_s1 + $0x348] sm:$0xff]  ;;  %v4461_v53 = vcombine.low %v134_v41, %v138_v42 }
  0x1c   :  { %v4460_v45 = vcombine.high %v133_v39, %v137_v40  ;;  %v141_v48 = vld [vmem:[%s7242_s1 + $0x340] sm:$0xff]  ;;  %v146_v51 = vld [vmem:[%s7242_s1 + $0x368] sm:$0xff]  ;;  %v4459_v52 = vcombine.low %v133_v39, %v137_v40 }
  0x1d   :  { %v145_v49 = vld [vmem:[%s7242_s1 + $0x360] sm:$0xff]  ;;  %v4470_v55 = vcombine.high %v142_v50, %v146_v51  ;;  %v150_v60 = vld [vmem:[%s7242_s1 + $0x388] sm:$0xff]  ;;  %v4469_v63 = vcombine.low %v142_v50, %v146_v51 }
  0x1e   :  { %1615 = vmatpush1.bf16.msra.mxu0 %v4411_v2  ;;  %1697 = vmatpush1.bf16.msra.mxu1 %v4413_v4  ;;  %v4468_v54 = vcombine.high %v141_v48, %v145_v49  ;;  %v149_v57 = vld [vmem:[%s7242_s1 + $0x380] sm:$0xff]  ;;  %v154_v61 = vld [vmem:[%s7242_s1 + $0x3a8] sm:$0xff]  ;;  %v4467_v62 = vcombine.low %v141_v48, %v145_v49 }
  0x1f   :  { %1616 = vmatprep.subr.bf16.mxu0 %v4420_v5  ;;  %1698 = vmatprep.subr.bf16.mxu1 %v4422_v6  ;;  %v153_v58 = vld [vmem:[%s7242_s1 + $0x3a0] sm:$0xff]  ;;  %v4478_v1 = vcombine.high %v150_v60, %v154_v61  ;;  %v158_v5 = vld [vmem:[%s7242_s1 + $0x3c8] sm:$0xff]  ;;  %v4477_v8 = vcombine.low %v150_v60, %v154_v61 }
  0x20   :  { %v4476_v0 = vcombine.high %v149_v57, %v153_v58  ;;  %v157_v2 = vld [vmem:[%s7242_s1 + $0x3c0] sm:$0xff]  ;;  %v162_v6 = vld [vmem:[%s7242_s1 + $0x3e8] sm:$0xff]  ;;  %v4475_v7 = vcombine.low %v149_v57, %v153_v58 }
  0x21   :  { %v161_v4 = vld [vmem:[%s7242_s1 + $0x3e0] sm:$0xff]  ;;  %v4486_v10 = vcombine.high %v158_v5, %v162_v6  ;;  %v4485_v16 = vcombine.low %v158_v5, %v162_v6  ;;  %v178_v23 = vld [vmem:[%s7242_s1 + $0x468] sm:$0xff] }
  0x22   :  { %1617 = vmatpush1.bf16.msra.mxu0 %v4419_v11  ;;  %1699 = vmatpush1.bf16.msra.mxu1 %v4421_v12  ;;  %v4484_v9 = vcombine.high %v157_v2, %v161_v4  ;;  %v165_v11 = vld [vmem:[%s7242_s1 + $0x400] sm:$0xff]  ;;  %v4483_v15 = vcombine.low %v157_v2, %v161_v4 }
  0x23   :  { %1618 = vmatprep.subr.bf16.mxu0 %v4428_v13  ;;  %1700 = vmatprep.subr.bf16.mxu1 %v4430_v14  ;;  %v169_v12 = vld [vmem:[%s7242_s1 + $0x420] sm:$0xff]  ;;  %v166_v13 = vld [vmem:[%s7242_s1 + $0x408] sm:$0xff] }
  0x24   :  { %v170_v14 = vld [vmem:[%s7242_s1 + $0x428] sm:$0xff]  ;;  %v4492_v17 = vcombine.high %v165_v11, %v169_v12  ;;  %v4491_v24 = vcombine.low %v165_v11, %v169_v12  ;;  %v189_v34 = vld [vmem:[%s7242_s1 + $0x4c0] sm:$0xff] }
  0x25   :  { %v4494_v18 = vcombine.high %v166_v13, %v170_v14  ;;  %v4493_v25 = vcombine.low %v166_v13, %v170_v14  ;;  %v197_v42 = vld [vmem:[%s7242_s1 + $0x500] sm:$0xff] }
  0x26   :  { %1619 = vmatpush1.bf16.msra.mxu0 %v4427_v19  ;;  %1701 = vmatpush1.bf16.msra.mxu1 %v4429_v20  ;;  %v173_v19 = vld [vmem:[%s7242_s1 + $0x440] sm:$0xff] }
  0x27   :  { %1620 = vmatprep.subr.bf16.mxu0 %v4436_v21  ;;  %1702 = vmatprep.subr.bf16.mxu1 %v4438_v22  ;;  %v177_v20 = vld [vmem:[%s7242_s1 + $0x460] sm:$0xff]  ;;  %v5713_v21 = vrot.slane %v5576_v59, %v5571_v56  ;;  %v174_v22 = vld [vmem:[%s7242_s1 + $0x448] sm:$0xff] }
  0x28   :  { %v4500_v26 = vcombine.high %v173_v19, %v177_v20  ;;  %v185_v56 = vld [vmem:[%s7242_s1 + $0x4a0] sm:$0xff]  ;;  %v182_v59 = vld [vmem:[%s7242_s1 + $0x488] sm:$0xff]  ;;  %v4499_v31 = vcombine.low %v173_v19, %v177_v20  ;;  %v4501_v32 = vcombine.low %v174_v22, %v178_v23 }
  0x29   :  { %v205_v51 = vld [vmem:[%s7242_s1 + $0x540] sm:$0xff] }
  0x2a   :  { %1621 = vmatpush1.bf16.msra.mxu0 %v4435_v27  ;;  %1703 = vmatpush1.bf16.msra.mxu1 %v4437_v28  ;;  %v181_v27 = vld [vmem:[%s7242_s1 + $0x480] sm:$0xff]  ;;  %v4502_v28 = vcombine.high %v174_v22, %v178_v23 }
  0x2b   :  { %1622 = vmatprep.subr.bf16.mxu0 %v4444_v29  ;;  %1704 = vmatprep.subr.bf16.mxu1 %v4446_v30  ;;  %v186_v29 = vld [vmem:[%s7242_s1 + $0x4a8] sm:$0xff]  ;;  %v5735_v30 = vcombine.high %v5593_v3, %v5593_v3  ;;  %v4508_v33 = vcombine.high %v181_v27, %v185_v56  ;;  %v4507_v39 = vcombine.low %v181_v27, %v185_v56  ;;  %v213_v61 = vld [vmem:[%s7242_s1 + $0x580] sm:$0xff] }
  0x2c   :  { %v4509_v40 = vcombine.low %v182_v59, %v186_v29  ;;  %v221_v6 = vld [vmem:[%s7242_s1 + $0x5c0] sm:$0xff]  ;;  %v242_v27 = vld [vmem:[%s7242_s1 + $0x668] sm:$0xff] }
  0x2d   :  { %v229_v14 = vld [vmem:[%s7242_s1 + $0x600] sm:$0xff] }
  0x2e   :  { %1623 = vmatpush1.bf16.msra.mxu0 %v4443_v35  ;;  %1705 = vmatpush1.bf16.msra.mxu1 %v4445_v36  ;;  %v193_v35 = vld [vmem:[%s7242_s1 + $0x4e0] sm:$0xff]  ;;  %v190_v36 = vld [vmem:[%s7242_s1 + $0x4c8] sm:$0xff] }
  0x2f   :  { %1624 = vmatprep.subr.bf16.mxu0 %v4452_v37  ;;  %1706 = vmatprep.subr.bf16.mxu1 %v4454_v38  ;;  %v4510_v37 = vcombine.high %v182_v59, %v186_v29  ;;  %v194_v38 = vld [vmem:[%s7242_s1 + $0x4e8] sm:$0xff]  ;;  %v4516_v41 = vcombine.high %v189_v34, %v193_v35  ;;  %v4515_v48 = vcombine.low %v189_v34, %v193_v35  ;;  %v237_v23 = vld [vmem:[%s7242_s1 + $0x640] sm:$0xff] }
  0x30   :  { %v4517_v49 = vcombine.low %v190_v36, %v194_v38  ;;  %v245_v29 = vld [vmem:[%s7242_s1 + $0x680] sm:$0xff]  ;;  %v250_v34 = vld [vmem:[%s7242_s1 + $0x6a8] sm:$0xff] }
  0x32   :  { %1625 = vmatpush1.bf16.msra.mxu0 %v4451_v43  ;;  %1707 = vmatpush1.bf16.msra.mxu1 %v4453_v44  ;;  %v201_v43 = vld [vmem:[%s7242_s1 + $0x520] sm:$0xff]  ;;  %v198_v44 = vld [vmem:[%s7242_s1 + $0x508] sm:$0xff] }
  0x33   :  { %1626 = vmatprep.subr.bf16.mxu0 %v4460_v45  ;;  %1708 = vmatprep.subr.bf16.mxu1 %v4462_v46  ;;  %v4518_v45 = vcombine.high %v190_v36, %v194_v38  ;;  %v202_v46 = vld [vmem:[%s7242_s1 + $0x528] sm:$0xff]  ;;  %v4524_v50 = vcombine.high %v197_v42, %v201_v43  ;;  %v4523_v57 = vcombine.low %v197_v42, %v201_v43  ;;  %v253_v38 = vld [vmem:[%s7242_s1 + $0x6c0] sm:$0xff] }
  0x34   :  { %v4525_v58 = vcombine.low %v198_v44, %v202_v46  ;;  %v258_v42 = vld [vmem:[%s7242_s1 + $0x6e8] sm:$0xff] }
  0x36   :  { %1627 = vmatpush1.bf16.msra.mxu0 %v4459_v52  ;;  %1709 = vmatpush1.bf16.msra.mxu1 %v4461_v53  ;;  %v209_v52 = vld [vmem:[%s7242_s1 + $0x560] sm:$0xff]  ;;  %v206_v53 = vld [vmem:[%s7242_s1 + $0x548] sm:$0xff] }
  0x37   :  { %1628 = vmatprep.subr.bf16.mxu0 %v4468_v54  ;;  %1710 = vmatprep.subr.bf16.mxu1 %v4470_v55  ;;  %v4526_v54 = vcombine.high %v198_v44, %v202_v46  ;;  %v210_v55 = vld [vmem:[%s7242_s1 + $0x568] sm:$0xff]  ;;  %v4532_v60 = vcombine.high %v205_v51, %v209_v52  ;;  %v4531_v2 = vcombine.low %v205_v51, %v209_v52  ;;  %v261_v46 = vld [vmem:[%s7242_s1 + $0x700] sm:$0xff] }
  0x38   :  { %v4533_v4 = vcombine.low %v206_v53, %v210_v55  ;;  %v266_v51 = vld [vmem:[%s7242_s1 + $0x728] sm:$0xff] }
  0x3a   :  { %1629 = vmatpush1.bf16.msra.mxu0 %v4467_v62  ;;  %1711 = vmatpush1.bf16.msra.mxu1 %v4469_v63  ;;  %v217_v62 = vld [vmem:[%s7242_s1 + $0x5a0] sm:$0xff]  ;;  %v214_v63 = vld [vmem:[%s7242_s1 + $0x588] sm:$0xff] }
  0x3b   :  { %1630 = vmatprep.subr.bf16.mxu0 %v4476_v0  ;;  %1712 = vmatprep.subr.bf16.mxu1 %v4478_v1  ;;  %v4534_v0 = vcombine.high %v206_v53, %v210_v55  ;;  %v218_v1 = vld [vmem:[%s7242_s1 + $0x5a8] sm:$0xff]  ;;  %v4540_v5 = vcombine.high %v213_v61, %v217_v62  ;;  %v4539_v11 = vcombine.low %v213_v61, %v217_v62  ;;  %v269_v55 = vld [vmem:[%s7242_s1 + $0x740] sm:$0xff] }
  0x3c   :  { %v4541_v12 = vcombine.low %v214_v63, %v218_v1  ;;  %v274_v61 = vld [vmem:[%s7242_s1 + $0x768] sm:$0xff] }
  0x3e   :  { %1631 = vmatpush1.bf16.msra.mxu0 %v4475_v7  ;;  %1713 = vmatpush1.bf16.msra.mxu1 %v4477_v8  ;;  %v225_v7 = vld [vmem:[%s7242_s1 + $0x5e0] sm:$0xff]  ;;  %v222_v8 = vld [vmem:[%s7242_s1 + $0x5c8] sm:$0xff] }
  0x3f   :  { %1632 = vmatprep.subr.bf16.mxu0 %v4484_v9  ;;  %1714 = vmatprep.subr.bf16.mxu1 %v4486_v10  ;;  %v4542_v9 = vcombine.high %v214_v63, %v218_v1  ;;  %v226_v10 = vld [vmem:[%s7242_s1 + $0x5e8] sm:$0xff]  ;;  %v4548_v13 = vcombine.high %v221_v6, %v225_v7  ;;  %v4547_v19 = vcombine.low %v221_v6, %v225_v7  ;;  %v277_v1 = vld [vmem:[%s7242_s1 + $0x780] sm:$0xff] }
  0x40   :  { %v4549_v20 = vcombine.low %v222_v8, %v226_v10  ;;  %v282_v6 = vld [vmem:[%s7242_s1 + $0x7a8] sm:$0xff] }
  0x42   :  { %1633 = vmatpush1.bf16.msra.mxu0 %v4483_v15  ;;  %1715 = vmatpush1.bf16.msra.mxu1 %v4485_v16  ;;  %v233_v15 = vld [vmem:[%s7242_s1 + $0x620] sm:$0xff]  ;;  %v230_v16 = vld [vmem:[%s7242_s1 + $0x608] sm:$0xff] }
  0x43   :  { %1643 = vmatprep.subr.bf16.mxu0 %v4492_v17  ;;  %1725 = vmatprep.subr.bf16.mxu1 %v4494_v18  ;;  %v4550_v17 = vcombine.high %v222_v8, %v226_v10  ;;  %v234_v18 = vld [vmem:[%s7242_s1 + $0x628] sm:$0xff]  ;;  %v4556_v22 = vcombine.high %v229_v14, %v233_v15  ;;  %v4555_v56 = vcombine.low %v229_v14, %v233_v15  ;;  %v285_v10 = vld [vmem:[%s7242_s1 + $0x7c0] sm:$0xff] }
  0x44   :  { %v4557_v59 = vcombine.low %v230_v16, %v234_v18  ;;  %v290_v14 = vld [vmem:[%s7242_s1 + $0x7e8] sm:$0xff] }
  0x45   :  { %1635 = vmatmul.mubr.bf16.vlgmr.msra.gmra.mrb[0].mxu0 %v5713_v21  ;;  %1717 = vmatmul.mubr.bf16.vlgmr.msra.gmra.mrb[0].mxu1 %v5713_v21 }
  0x46   :  { %1644 = vmatpush1.bf16.msra.mxu0 %v4491_v24  ;;  %1726 = vmatpush1.bf16.msra.mxu1 %v4493_v25  ;;  %v241_v24 = vld [vmem:[%s7242_s1 + $0x660] sm:$0xff]  ;;  %v238_v25 = vld [vmem:[%s7242_s1 + $0x648] sm:$0xff] }
  0x47   :  { %1645 = vmatprep.subr.bf16.mxu0 %v4500_v26  ;;  %1727 = vmatprep.subr.bf16.mxu1 %v4502_v28  ;;  %v4558_v26 = vcombine.high %v230_v16, %v234_v18  ;;  %v4564_v28 = vcombine.high %v237_v23, %v241_v24  ;;  %v4563_v35 = vcombine.low %v237_v23, %v241_v24  ;;  %v39_v18 = vld [vmem:[%s7242_s1 + $0x10] sm:$0xff]  ;;  %v44_v23 = vld [vmem:[%s7242_s1 + $0x38] sm:$0xff] }
  0x48   :  { %1675 = vmatprep.mubr.bf16.mxu0 %v5735_v30  ;;  %1757 = vmatprep.mubr.bf16.mxu1 %v5735_v30  ;;  %v4565_v36 = vcombine.low %v238_v25, %v242_v27 }
  0x4a   :  { %1646 = vmatpush1.bf16.msra.mxu0 %v4499_v31  ;;  %1728 = vmatpush1.bf16.msra.mxu1 %v4501_v32  ;;  %v249_v31 = vld [vmem:[%s7242_s1 + $0x6a0] sm:$0xff]  ;;  %v246_v32 = vld [vmem:[%s7242_s1 + $0x688] sm:$0xff] }
  0x4b   :  { %1647 = vmatprep.subr.bf16.mxu0 %v4508_v33  ;;  %1729 = vmatprep.subr.bf16.mxu1 %v4510_v37  ;;  %v4566_v33 = vcombine.high %v238_v25, %v242_v27  ;;  %v4572_v37 = vcombine.high %v245_v29, %v249_v31  ;;  %v4571_v43 = vcombine.low %v245_v29, %v249_v31  ;;  %v47_v27 = vld [vmem:[%s7242_s1 + $0x50] sm:$0xff]  ;;  %v52_v29 = vld [vmem:[%s7242_s1 + $0x78] sm:$0xff] }
  0x4c   :  { %v4573_v44 = vcombine.low %v246_v32, %v250_v34  ;;  %v5923_v31 = vcombine.high %v5713_v21, %v5713_v21 }
  0x4e   :  { %1648 = vmatpush1.bf16.msra.mxu0 %v4507_v39  ;;  %1730 = vmatpush1.bf16.msra.mxu1 %v4509_v40  ;;  %v257_v39 = vld [vmem:[%s7242_s1 + $0x6e0] sm:$0xff]  ;;  %v254_v40 = vld [vmem:[%s7242_s1 + $0x6c8] sm:$0xff] }
  0x4f   :  { %1649 = vmatprep.subr.bf16.mxu0 %v4516_v41  ;;  %1731 = vmatprep.subr.bf16.mxu1 %v4518_v45  ;;  %v4574_v41 = vcombine.high %v246_v32, %v250_v34  ;;  %v4580_v45 = vcombine.high %v253_v38, %v257_v39  ;;  %v4579_v52 = vcombine.low %v253_v38, %v257_v39  ;;  %v59_v34 = vld [vmem:[%s7242_s1 + $0xb0] sm:$0xff]  ;;  %v60_v38 = vld [vmem:[%s7242_s1 + $0xb8] sm:$0xff] }
  0x50   :  { %v4581_v53 = vcombine.low %v254_v40, %v258_v42 }
  0x52   :  { %1650 = vmatpush1.bf16.msra.mxu0 %v4515_v48  ;;  %1732 = vmatpush1.bf16.msra.mxu1 %v4517_v49  ;;  %v265_v48 = vld [vmem:[%s7242_s1 + $0x720] sm:$0xff]  ;;  %v262_v49 = vld [vmem:[%s7242_s1 + $0x708] sm:$0xff] }
  0x53   :  { %1651 = vmatprep.subr.bf16.mxu0 %v4524_v50  ;;  %1733 = vmatprep.subr.bf16.mxu1 %v4526_v54  ;;  %v4582_v50 = vcombine.high %v254_v40, %v258_v42  ;;  %v4588_v54 = vcombine.high %v261_v46, %v265_v48  ;;  %v4587_v62 = vcombine.low %v261_v46, %v265_v48  ;;  %v64_v46 = vld [vmem:[%s7242_s1 + $0xd8] sm:$0xff] }
  0x54   :  { %v4589_v63 = vcombine.low %v262_v49, %v266_v51  ;;  %v68_v48 = vld [vmem:[%s7242_s1 + $0xf8] sm:$0xff] }
  0x56   :  { %1652 = vmatpush1.bf16.msra.mxu0 %v4523_v57  ;;  %1734 = vmatpush1.bf16.msra.mxu1 %v4525_v58  ;;  %v273_v57 = vld [vmem:[%s7242_s1 + $0x760] sm:$0xff]  ;;  %v270_v58 = vld [vmem:[%s7242_s1 + $0x748] sm:$0xff] }
  0x57   :  { %1653 = vmatprep.subr.bf16.mxu0 %v4532_v60  ;;  %1735 = vmatprep.subr.bf16.mxu1 %v4534_v0  ;;  %v4590_v60 = vcombine.high %v262_v49, %v266_v51  ;;  %v4596_v0 = vcombine.high %v269_v55, %v273_v57  ;;  %v4595_v7 = vcombine.low %v269_v55, %v273_v57  ;;  %v76_v55 = vld [vmem:[%s7242_s1 + $0x138] sm:$0xff] }
  0x58   :  { %v4597_v8 = vcombine.low %v270_v58, %v274_v61 }
  0x5a   :  { %1654 = vmatpush1.bf16.msra.mxu0 %v4531_v2  ;;  %1736 = vmatpush1.bf16.msra.mxu1 %v4533_v4  ;;  %v281_v2 = vld [vmem:[%s7242_s1 + $0x7a0] sm:$0xff]  ;;  %v278_v4 = vld [vmem:[%s7242_s1 + $0x788] sm:$0xff] }
  0x5b   :  { %1655 = vmatprep.subr.bf16.mxu0 %v4540_v5  ;;  %1737 = vmatprep.subr.bf16.mxu1 %v4542_v9  ;;  %v4598_v5 = vcombine.high %v270_v58, %v274_v61  ;;  %v4604_v9 = vcombine.high %v277_v1, %v281_v2  ;;  %v4603_v15 = vcombine.low %v277_v1, %v281_v2  ;;  %v79_v61 = vld [vmem:[%s7242_s1 + $0x150] sm:$0xff]  ;;  %v84_v1 = vld [vmem:[%s7242_s1 + $0x178] sm:$0xff] }
  0x5c   :  { %v4605_v16 = vcombine.low %v278_v4, %v282_v6  ;;  %v4393_v58 = vcombine.low %v64_v46, %v68_v48 }
  0x5e   :  { %1656 = vmatpush1.bf16.msra.mxu0 %v4539_v11  ;;  %1738 = vmatpush1.bf16.msra.mxu1 %v4541_v12  ;;  %v289_v11 = vld [vmem:[%s7242_s1 + $0x7e0] sm:$0xff]  ;;  %v286_v12 = vld [vmem:[%s7242_s1 + $0x7c8] sm:$0xff] }
  0x5f   :  { %1657 = vmatprep.subr.bf16.mxu0 %v4548_v13  ;;  %1739 = vmatprep.subr.bf16.mxu1 %v4550_v17  ;;  %v4606_v13 = vcombine.high %v278_v4, %v282_v6  ;;  %v4612_v17 = vcombine.high %v285_v10, %v289_v11  ;;  %v4611_v24 = vcombine.low %v285_v10, %v289_v11  ;;  %v87_v6 = vld [vmem:[%s7242_s1 + $0x190] sm:$0xff]  ;;  %v92_v10 = vld [vmem:[%s7242_s1 + $0x1b8] sm:$0xff] }
  0x60   :  { %v4613_v25 = vcombine.low %v286_v12, %v290_v14 }
  0x62   :  { %1658 = vmatpush1.bf16.msra.mxu0 %v4547_v19  ;;  %1740 = vmatpush1.bf16.msra.mxu1 %v4549_v20  ;;  %v43_v19 = vld [vmem:[%s7242_s1 + $0x30] sm:$0xff]  ;;  %v40_v20 = vld [vmem:[%s7242_s1 + $0x18] sm:$0xff] }
  0x63   :  { %1659 = vmatprep.subr.bf16.mxu0 %v4556_v22  ;;  %1741 = vmatprep.subr.bf16.mxu1 %v4558_v26  ;;  %v4614_v22 = vcombine.high %v286_v12, %v290_v14  ;;  %v4368_v26 = vcombine.high %v39_v18, %v43_v19  ;;  %v4367_v32 = vcombine.low %v39_v18, %v43_v19  ;;  %v95_v14 = vld [vmem:[%s7242_s1 + $0x1d0] sm:$0xff]  ;;  %v100_v18 = vld [vmem:[%s7242_s1 + $0x1f8] sm:$0xff] }
  0x66   :  { %1660 = vmatpush1.bf16.msra.mxu0 %v4555_v56  ;;  %1742 = vmatpush1.bf16.msra.mxu1 %v4557_v59  ;;  %v51_v56 = vld [vmem:[%s7242_s1 + $0x70] sm:$0xff]  ;;  %v48_v59 = vld [vmem:[%s7242_s1 + $0x58] sm:$0xff] }
  0x67   :  { %1661 = vmatprep.subr.bf16.mxu0 %v4564_v28  ;;  %1743 = vmatprep.subr.bf16.mxu1 %v4566_v33  ;;  %v4370_v28 = vcombine.high %v40_v20, %v44_v23  ;;  %v55_v33 = vld [vmem:[%s7242_s1 + $0x90] sm:$0xff]  ;;  %v4378_v39 = vcombine.high %v48_v59, %v52_v29  ;;  %v4375_v40 = vcombine.low %v47_v27, %v51_v56 }
  0x68   :  { %v4384_v42 = vcombine.high %v55_v33, %v59_v34  ;;  %v4383_v49 = vcombine.low %v55_v33, %v59_v34  ;;  %v112_v33 = vld [vmem:[%s7242_s1 + $0x258] sm:$0xff] }
  0x6a   :  { %1662 = vmatpush1.bf16.msra.mxu0 %v4563_v35  ;;  %1744 = vmatpush1.bf16.msra.mxu1 %v4565_v36  ;;  %v4369_v35 = vcombine.low %v40_v20, %v44_v23  ;;  %v4376_v36 = vcombine.high %v47_v27, %v51_v56  ;;  %v103_v23 = vld [vmem:[%s7242_s1 + $0x210] sm:$0xff]  ;;  %v108_v27 = vld [vmem:[%s7242_s1 + $0x238] sm:$0xff] }
  0x6b   :  { %1663 = vmatprep.subr.bf16.mxu0 %v4572_v37  ;;  %1745 = vmatprep.subr.bf16.mxu1 %v4574_v41  ;;  %v56_v37 = vld [vmem:[%s7242_s1 + $0x98] sm:$0xff]  ;;  %v4377_v41 = vcombine.low %v48_v59, %v52_v29  ;;  %v111_v29 = vld [vmem:[%s7242_s1 + $0x250] sm:$0xff] }
  0x6e   :  { %1664 = vmatpush1.bf16.msra.mxu0 %v4571_v43  ;;  %1746 = vmatpush1.bf16.msra.mxu1 %v4573_v44  ;;  %v63_v43 = vld [vmem:[%s7242_s1 + $0xd0] sm:$0xff] }
  0x6f   :  { %1665 = vmatprep.subr.bf16.mxu0 %v4580_v45  ;;  %1747 = vmatprep.subr.bf16.mxu1 %v4582_v50  ;;  %v67_v44 = vld [vmem:[%s7242_s1 + $0xf0] sm:$0xff]  ;;  %v4386_v45 = vcombine.high %v56_v37, %v60_v38  ;;  %v4385_v50 = vcombine.low %v56_v37, %v60_v38 }
  0x70   :  { %v4392_v51 = vcombine.high %v63_v43, %v67_v44  ;;  %v4391_v57 = vcombine.low %v63_v43, %v67_v44  ;;  %v124_v43 = vld [vmem:[%s7242_s1 + $0x2b8] sm:$0xff] }
  0x72   :  { %1666 = vmatpush1.bf16.msra.mxu0 %v4579_v52  ;;  %1748 = vmatpush1.bf16.msra.mxu1 %v4581_v53  ;;  %v71_v52 = vld [vmem:[%s7242_s1 + $0x110] sm:$0xff] }
  0x73   :  { %1667 = vmatprep.subr.bf16.mxu0 %v4588_v54  ;;  %1749 = vmatprep.subr.bf16.mxu1 %v4590_v60  ;;  %v75_v53 = vld [vmem:[%s7242_s1 + $0x130] sm:$0xff]  ;;  %v72_v54 = vld [vmem:[%s7242_s1 + $0x118] sm:$0xff] }
  0x74   :  { %v4400_v60 = vcombine.high %v71_v52, %v75_v53  ;;  %v4399_v2 = vcombine.low %v71_v52, %v75_v53  ;;  %v4401_v4 = vcombine.low %v72_v54, %v76_v55  ;;  %v132_v52 = vld [vmem:[%s7242_s1 + $0x2f8] sm:$0xff] }
  0x76   :  { %1668 = vmatpush1.bf16.msra.mxu0 %v4587_v62  ;;  %1750 = vmatpush1.bf16.msra.mxu1 %v4589_v63  ;;  %v83_v62 = vld [vmem:[%s7242_s1 + $0x170] sm:$0xff]  ;;  %v80_v63 = vld [vmem:[%s7242_s1 + $0x158] sm:$0xff] }
  0x77   :  { %1669 = vmatprep.subr.bf16.mxu0 %v4596_v0  ;;  %1751 = vmatprep.subr.bf16.mxu1 %v4598_v5  ;;  %v4402_v0 = vcombine.high %v72_v54, %v76_v55  ;;  %v4408_v5 = vcombine.high %v79_v61, %v83_v62  ;;  %v4407_v11 = vcombine.low %v79_v61, %v83_v62  ;;  %v135_v55 = vld [vmem:[%s7242_s1 + $0x310] sm:$0xff]  ;;  %v140_v61 = vld [vmem:[%s7242_s1 + $0x338] sm:$0xff] }
  0x78   :  { %v4409_v12 = vcombine.low %v80_v63, %v84_v1 }
  0x7a   :  { %1670 = vmatpush1.bf16.msra.mxu0 %v4595_v7  ;;  %1752 = vmatpush1.bf16.msra.mxu1 %v4597_v8  ;;  %v91_v7 = vld [vmem:[%s7242_s1 + $0x1b0] sm:$0xff]  ;;  %v88_v8 = vld [vmem:[%s7242_s1 + $0x198] sm:$0xff] }
  0x7b   :  { %1671 = vmatprep.subr.bf16.mxu0 %v4604_v9  ;;  %1753 = vmatprep.subr.bf16.mxu1 %v4606_v13  ;;  %v4410_v9 = vcombine.high %v80_v63, %v84_v1  ;;  %v4416_v13 = vcombine.high %v87_v6, %v91_v7  ;;  %v4415_v19 = vcombine.low %v87_v6, %v91_v7  ;;  %v143_v1 = vld [vmem:[%s7242_s1 + $0x350] sm:$0xff]  ;;  %v148_v6 = vld [vmem:[%s7242_s1 + $0x378] sm:$0xff] }
  0x7c   :  { %v4417_v20 = vcombine.low %v88_v8, %v92_v10 }
  0x7e   :  { %1672 = vmatpush1.bf16.msra.mxu0 %v4603_v15  ;;  %1754 = vmatpush1.bf16.msra.mxu1 %v4605_v16  ;;  %v99_v15 = vld [vmem:[%s7242_s1 + $0x1f0] sm:$0xff]  ;;  %v96_v16 = vld [vmem:[%s7242_s1 + $0x1d8] sm:$0xff] }
  0x7f   :  { %1673 = vmatprep.subr.bf16.mxu0 %v4612_v17  ;;  %1755 = vmatprep.subr.bf16.mxu1 %v4614_v22  ;;  %v4418_v17 = vcombine.high %v88_v8, %v92_v10  ;;  %v4424_v22 = vcombine.high %v95_v14, %v99_v15  ;;  %v4423_v56 = vcombine.low %v95_v14, %v99_v15  ;;  %v151_v8 = vld [vmem:[%s7242_s1 + $0x390] sm:$0xff] }
  0x80   :  { %v4425_v59 = vcombine.low %v96_v16, %v100_v18 }
  0x82   :  { %1674 = vmatpush1.bf16.msra.mxu0 %v4611_v24  ;;  %1756 = vmatpush1.bf16.msra.mxu1 %v4613_v25  ;;  %v107_v24 = vld [vmem:[%s7242_s1 + $0x230] sm:$0xff]  ;;  %v104_v25 = vld [vmem:[%s7242_s1 + $0x218] sm:$0xff] }
  0x83   :  { %1766 = vmatprep.subr.bf16.mxu0 %v4368_v26  ;;  %1848 = vmatprep.subr.bf16.mxu1 %v4370_v28  ;;  %v4426_v26 = vcombine.high %v96_v16, %v100_v18  ;;  %v4432_v28 = vcombine.high %v103_v23, %v107_v24  ;;  %v4434_v34 = vcombine.high %v104_v25, %v108_v27  ;;  %v159_v16 = vld [vmem:[%s7242_s1 + $0x3d0] sm:$0xff] }
  0x84   :  { %v4433_v37 = vcombine.low %v104_v25, %v108_v27  ;;  %v167_v25 = vld [vmem:[%s7242_s1 + $0x410] sm:$0xff] }
  0x85   :  { %1676 = vmatmul.mubr.bf16.vlgmr.msra.gmra.mrb[0].mxu0 %v5923_v31  ;;  %1758 = vmatmul.mubr.bf16.vlgmr.msra.gmra.mrb[0].mxu1 %v5923_v31 }
  0x86   :  { %1767 = vmatpush1.bf16.msra.mxu0 %v4367_v32  ;;  %1849 = vmatpush1.bf16.msra.mxu1 %v4369_v35  ;;  %v115_v32 = vld [vmem:[%s7242_s1 + $0x270] sm:$0xff]  ;;  %v116_v35 = vld [vmem:[%s7242_s1 + $0x278] sm:$0xff] }
  0x87   :  { %1768 = vmatprep.subr.bf16.mxu0 %v4376_v36  ;;  %1850 = vmatprep.subr.bf16.mxu1 %v4378_v39  ;;  %v4431_v36 = vcombine.low %v103_v23, %v107_v24  ;;  %v4440_v38 = vcombine.high %v111_v29, %v115_v32  ;;  %v119_v39 = vld [vmem:[%s7242_s1 + $0x290] sm:$0xff]  ;;  %v4439_v44 = vcombine.low %v111_v29, %v115_v32 }
  0x88   :  { %1798 = vmatprep.mubr.bf16.mxu0 %v5593_v3  ;;  %1880 = vmatprep.mubr.bf16.mxu1 %v5593_v3  ;;  %v4394_v3 = vcombine.high %v64_v46, %v68_v48  ;;  %v127_v48 = vld [vmem:[%s7242_s1 + $0x2d0] sm:$0xff] }
  0x8a   :  { %1769 = vmatpush1.bf16.msra.mxu0 %v4375_v40  ;;  %1851 = vmatpush1.bf16.msra.mxu1 %v4377_v41  ;;  %v123_v40 = vld [vmem:[%s7242_s1 + $0x2b0] sm:$0xff]  ;;  %v120_v41 = vld [vmem:[%s7242_s1 + $0x298] sm:$0xff] }
  0x8b   :  { %1770 = vmatprep.subr.bf16.mxu0 %v4384_v42  ;;  %1852 = vmatprep.subr.bf16.mxu1 %v4386_v45  ;;  %v4442_v42 = vcombine.high %v112_v33, %v116_v35  ;;  %v4441_v45 = vcombine.low %v112_v33, %v116_v35  ;;  %v4448_v46 = vcombine.high %v119_v39, %v123_v40  ;;  %v175_v33 = vld [vmem:[%s7242_s1 + $0x450] sm:$0xff] }
  0x8c   :  { %v4447_v53 = vcombine.low %v119_v39, %v123_v40  ;;  %v4449_v54 = vcombine.low %v120_v41, %v124_v43 }
  0x8e   :  { %1771 = vmatpush1.bf16.msra.mxu0 %v4383_v49  ;;  %1853 = vmatpush1.bf16.msra.mxu1 %v4385_v50  ;;  %v131_v49 = vld [vmem:[%s7242_s1 + $0x2f0] sm:$0xff]  ;;  %v128_v50 = vld [vmem:[%s7242_s1 + $0x2d8] sm:$0xff] }
  0x8f   :  { %1772 = vmatprep.subr.bf16.mxu0 %v4392_v51  ;;  %1854 = vmatprep.subr.bf16.mxu1 %v4394_v3  ;;  %v4450_v51 = vcombine.high %v120_v41, %v124_v43  ;;  %v4456_v3 = vcombine.high %v127_v48, %v131_v49  ;;  %v4455_v62 = vcombine.low %v127_v48, %v131_v49  ;;  %v183_v41 = vld [vmem:[%s7242_s1 + $0x490] sm:$0xff] }
  0x90   :  { %v4457_v63 = vcombine.low %v128_v50, %v132_v52 }
  0x92   :  { %1773 = vmatpush1.bf16.msra.mxu0 %v4391_v57  ;;  %1855 = vmatpush1.bf16.msra.mxu1 %v4393_v58  ;;  %v139_v57 = vld [vmem:[%s7242_s1 + $0x330] sm:$0xff]  ;;  %v136_v58 = vld [vmem:[%s7242_s1 + $0x318] sm:$0xff] }
  0x93   :  { %1774 = vmatprep.subr.bf16.mxu0 %v4400_v60  ;;  %1856 = vmatprep.subr.bf16.mxu1 %v4402_v0  ;;  %v4458_v60 = vcombine.high %v128_v50, %v132_v52  ;;  %v4464_v0 = vcombine.high %v135_v55, %v139_v57  ;;  %v4463_v7 = vcombine.low %v135_v55, %v139_v57  ;;  %v191_v50 = vld [vmem:[%s7242_s1 + $0x4d0] sm:$0xff] }
  0x94   :  { %v4465_v10 = vcombine.low %v136_v58, %v140_v61  ;;  %v199_v57 = vld [vmem:[%s7242_s1 + $0x510] sm:$0xff] }
  0x96   :  { %1775 = vmatpush1.bf16.msra.mxu0 %v4399_v2  ;;  %1857 = vmatpush1.bf16.msra.mxu1 %v4401_v4  ;;  %v147_v2 = vld [vmem:[%s7242_s1 + $0x370] sm:$0xff]  ;;  %v144_v4 = vld [vmem:[%s7242_s1 + $0x358] sm:$0xff] }
  0x97   :  { %1776 = vmatprep.subr.bf16.mxu0 %v4408_v5  ;;  %1858 = vmatprep.subr.bf16.mxu1 %v4410_v9  ;;  %v4466_v5 = vcombine.high %v136_v58, %v140_v61  ;;  %v155_v9 = vld [vmem:[%s7242_s1 + $0x3b0] sm:$0xff]  ;;  %v4474_v14 = vcombine.high %v144_v4, %v148_v6  ;;  %v4471_v15 = vcombine.low %v143_v1, %v147_v2 }
  0x98   :  { %v4473_v18 = vcombine.low %v144_v4, %v148_v6  ;;  %v4479_v24 = vcombine.low %v151_v8, %v155_v9  ;;  %v203_v58 = vld [vmem:[%s7242_s1 + $0x530] sm:$0xff]  ;;  %v208_v6 = vld [vmem:[%s7242_s1 + $0x558] sm:$0xff] }
  0x9a   :  { %1777 = vmatpush1.bf16.msra.mxu0 %v4407_v11  ;;  %1859 = vmatpush1.bf16.msra.mxu1 %v4409_v12  ;;  %v4472_v11 = vcombine.high %v143_v1, %v147_v2  ;;  %v152_v12 = vld [vmem:[%s7242_s1 + $0x398] sm:$0xff]  ;;  %v207_v1 = vld [vmem:[%s7242_s1 + $0x550] sm:$0xff] }
  0x9b   :  { %1778 = vmatprep.subr.bf16.mxu0 %v4416_v13  ;;  %1860 = vmatprep.subr.bf16.mxu1 %v4418_v17  ;;  %v156_v13 = vld [vmem:[%s7242_s1 + $0x3b8] sm:$0xff]  ;;  %v163_v17 = vld [vmem:[%s7242_s1 + $0x3f0] sm:$0xff] }
  0x9c   :  { %v4482_v23 = vcombine.high %v152_v12, %v156_v13  ;;  %v4481_v27 = vcombine.low %v152_v12, %v156_v13  ;;  %v4487_v32 = vcombine.low %v159_v16, %v163_v17  ;;  %v211_v2 = vld [vmem:[%s7242_s1 + $0x570] sm:$0xff] }
  0x9e   :  { %1779 = vmatpush1.bf16.msra.mxu0 %v4415_v19  ;;  %1861 = vmatpush1.bf16.msra.mxu1 %v4417_v20  ;;  %v4480_v19 = vcombine.high %v151_v8, %v155_v9  ;;  %v160_v20 = vld [vmem:[%s7242_s1 + $0x3d8] sm:$0xff]  ;;  %v4527_v9 = vcombine.low %v199_v57, %v203_v58 }
  0x9f   :  { %1780 = vmatprep.subr.bf16.mxu0 %v4424_v22  ;;  %1862 = vmatprep.subr.bf16.mxu1 %v4426_v26  ;;  %v164_v22 = vld [vmem:[%s7242_s1 + $0x3f8] sm:$0xff]  ;;  %v171_v26 = vld [vmem:[%s7242_s1 + $0x430] sm:$0xff] }
  0xa0   :  { %v4490_v29 = vcombine.high %v160_v20, %v164_v22  ;;  %v4489_v35 = vcombine.low %v160_v20, %v164_v22  ;;  %v4495_v40 = vcombine.low %v167_v25, %v171_v26 }
  0xa2   :  { %1781 = vmatpush1.bf16.msra.mxu0 %v4423_v56  ;;  %1863 = vmatpush1.bf16.msra.mxu1 %v4425_v59  ;;  %v4488_v56 = vcombine.high %v159_v16, %v163_v17  ;;  %v168_v59 = vld [vmem:[%s7242_s1 + $0x418] sm:$0xff] }
  0xa3   :  { %1782 = vmatprep.subr.bf16.mxu0 %v4432_v28  ;;  %1864 = vmatprep.subr.bf16.mxu1 %v4434_v34  ;;  %v172_v28 = vld [vmem:[%s7242_s1 + $0x438] sm:$0xff]  ;;  %v179_v34 = vld [vmem:[%s7242_s1 + $0x470] sm:$0xff] }
  0xa4   :  { %v4498_v39 = vcombine.high %v168_v59, %v172_v28  ;;  %v4497_v43 = vcombine.low %v168_v59, %v172_v28  ;;  %v4503_v49 = vcombine.low %v175_v33, %v179_v34 }
  0xa6   :  { %1783 = vmatpush1.bf16.msra.mxu0 %v4431_v36  ;;  %1865 = vmatpush1.bf16.msra.mxu1 %v4433_v37  ;;  %v4496_v36 = vcombine.high %v167_v25, %v171_v26  ;;  %v176_v37 = vld [vmem:[%s7242_s1 + $0x458] sm:$0xff] }
  0xa7   :  { %1784 = vmatprep.subr.bf16.mxu0 %v4440_v38  ;;  %1866 = vmatprep.subr.bf16.mxu1 %v4442_v42  ;;  %v180_v38 = vld [vmem:[%s7242_s1 + $0x478] sm:$0xff]  ;;  %v187_v42 = vld [vmem:[%s7242_s1 + $0x4b0] sm:$0xff] }
  0xa8   :  { %v4506_v48 = vcombine.high %v176_v37, %v180_v38  ;;  %v4505_v52 = vcombine.low %v176_v37, %v180_v38  ;;  %v4511_v55 = vcombine.low %v183_v41, %v187_v42 }
  0xaa   :  { %1785 = vmatpush1.bf16.msra.mxu0 %v4439_v44  ;;  %1867 = vmatpush1.bf16.msra.mxu1 %v4441_v45  ;;  %v4504_v44 = vcombine.high %v175_v33, %v179_v34  ;;  %v184_v45 = vld [vmem:[%s7242_s1 + $0x498] sm:$0xff] }
  0xab   :  { %1786 = vmatprep.subr.bf16.mxu0 %v4448_v46  ;;  %1868 = vmatprep.subr.bf16.mxu1 %v4450_v51  ;;  %v188_v46 = vld [vmem:[%s7242_s1 + $0x4b8] sm:$0xff]  ;;  %v195_v51 = vld [vmem:[%s7242_s1 + $0x4f0] sm:$0xff] }
  0xac   :  { %v4520_v61 = vcombine.high %v191_v50, %v195_v51 }
  0xae   :  { %1787 = vmatpush1.bf16.msra.mxu0 %v4447_v53  ;;  %1869 = vmatpush1.bf16.msra.mxu1 %v4449_v54  ;;  %v4512_v53 = vcombine.high %v183_v41, %v187_v42  ;;  %v192_v54 = vld [vmem:[%s7242_s1 + $0x4d8] sm:$0xff] }
  0xaf   :  { %1788 = vmatprep.subr.bf16.mxu0 %v4456_v3  ;;  %1870 = vmatprep.subr.bf16.mxu1 %v4458_v60  ;;  %v4514_v3 = vcombine.high %v184_v45, %v188_v46  ;;  %v4513_v60 = vcombine.low %v184_v45, %v188_v46 }
  0xb2   :  { %1789 = vmatpush1.bf16.msra.mxu0 %v4455_v62  ;;  %1871 = vmatpush1.bf16.msra.mxu1 %v4457_v63  ;;  %v200_v62 = vld [vmem:[%s7242_s1 + $0x518] sm:$0xff] }
  0xb3   :  { %1790 = vmatprep.subr.bf16.mxu0 %v4464_v0  ;;  %1872 = vmatprep.subr.bf16.mxu1 %v4466_v5  ;;  %v4519_v0 = vcombine.low %v191_v50, %v195_v51  ;;  %v4528_v5 = vcombine.high %v199_v57, %v203_v58 }
  0xb6   :  { %1791 = vmatpush1.bf16.msra.mxu0 %v4463_v7  ;;  %1873 = vmatpush1.bf16.msra.mxu1 %v4465_v10  ;;  %v212_v7 = vld [vmem:[%s7242_s1 + $0x578] sm:$0xff] }
  0xb7   :  { %1792 = vmatprep.subr.bf16.mxu0 %v4472_v11  ;;  %1874 = vmatprep.subr.bf16.mxu1 %v4474_v14 }
  0xba   :  { %1793 = vmatpush1.bf16.msra.mxu0 %v4471_v15  ;;  %1875 = vmatpush1.bf16.msra.mxu1 %v4473_v18 }
  0xbb   :  { %1794 = vmatprep.subr.bf16.mxu0 %v4480_v19  ;;  %1876 = vmatprep.subr.bf16.mxu1 %v4482_v23 }
  0xbe   :  { %1795 = vmatpush1.bf16.msra.mxu0 %v4479_v24  ;;  %1877 = vmatpush1.bf16.msra.mxu1 %v4481_v27 }
  0xbf   :  { %1796 = vmatprep.subr.bf16.mxu0 %v4488_v56  ;;  %1878 = vmatprep.subr.bf16.mxu1 %v4490_v29 }
  0xc2   :  { %1797 = vmatpush1.bf16.msra.mxu0 %v4487_v32  ;;  %1879 = vmatpush1.bf16.msra.mxu1 %v4489_v35 }
  0xc3   :  { %1807 = vmatprep.subr.bf16.mxu0 %v4496_v36  ;;  %1889 = vmatprep.subr.bf16.mxu1 %v4498_v39 }
  0xc5   :  { %1799 = vmatmul.mubr.bf16.vlgmr.msra.gmra.mrb[4].mxu0 %v5713_v21  ;;  %1881 = vmatmul.mubr.bf16.vlgmr.msra.gmra.mrb[4].mxu1 %v5713_v21  ;;  %v196_v21 = vld [vmem:[%s7242_s1 + $0x4f8] sm:$0xff] }
  0xc6   :  { %1808 = vmatpush1.bf16.msra.mxu0 %v4495_v40  ;;  %1890 = vmatpush1.bf16.msra.mxu1 %v4497_v43  ;;  %v4522_v63 = vcombine.high %v192_v54, %v196_v21  ;;  %v4521_v4 = vcombine.low %v192_v54, %v196_v21 }
  0xc7   :  { %1809 = vmatprep.subr.bf16.mxu0 %v4504_v44  ;;  %1891 = vmatprep.subr.bf16.mxu1 %v4506_v48 }
  0xc8   :  { %1839 = vmatprep.mubr.bf16.mxu0 %v5735_v30  ;;  %1921 = vmatprep.mubr.bf16.mxu1 %v5735_v30  ;;  %v204_v30 = vld [vmem:[%s7242_s1 + $0x538] sm:$0xff] }
  0xc9   :  { %v4530_v8 = vcombine.high %v200_v62, %v204_v30 }
  0xca   :  { %1810 = vmatpush1.bf16.msra.mxu0 %v4503_v49  ;;  %1892 = vmatpush1.bf16.msra.mxu1 %v4505_v52 }
  0xcb   :  { %1811 = vmatprep.subr.bf16.mxu0 %v4512_v53  ;;  %1893 = vmatprep.subr.bf16.mxu1 %v4514_v3 }
  0xce   :  { %1812 = vmatpush1.bf16.msra.mxu0 %v4511_v55  ;;  %1894 = vmatpush1.bf16.msra.mxu1 %v4513_v60 }
  0xcf   :  { %1813 = vmatprep.subr.bf16.mxu0 %v4520_v61  ;;  %1895 = vmatprep.subr.bf16.mxu1 %v4522_v63 }
  0xd2   :  { %1814 = vmatpush1.bf16.msra.mxu0 %v4519_v0 }
  0xd3   :  { %12 = vsyncpa [#allocation4], 0  ;;  %1896 = vmatpush1.bf16.msra.mxu1 %v4521_v4  ;;  %1815 = vmatprep.subr.bf16.mxu0 %v4528_v5  ;;  %v4529_v10 = vcombine.low %v200_v62, %v204_v30  ;;  %v4536_v11 = vcombine.high %v207_v1, %v211_v2  ;;  %v4538_v12 = vcombine.high %v208_v6, %v212_v7  ;;  %v215_v13 = vld [vmem:[%s7242_s1 + $0x590] sm:$0xff]  ;;  %v216_v15 = vld [vmem:[%s7242_s1 + $0x598] sm:$0xff]  ;;  %s5443_s20 = smov [#allocation3]  }
  0xd4   :  { %1897 = vmatprep.subr.bf16.mxu1 %v4530_v8  ;;  %v219_v14 = vld [vmem:[%s7242_s1 + $0x5b0] sm:$0xff]  ;;  %v220_v16 = vld [vmem:[%s7242_s1 + $0x5b8] sm:$0xff]  ;;  %v4535_v17 = vcombine.low %v207_v1, %v211_v2  ;;  %v4537_v18 = vcombine.low %v208_v6, %v212_v7  ;;  %s4354_s21 = sshll.u32 %s5443_s20, 4  ;;  %s4355_s21 = int_to_ptr.vmem [resolvable:$true] %s4354_s21 }
  0xd5   :  { %v4544_v19 = vcombine.high %v215_v13, %v219_v14  ;;  %v4546_v20 = vcombine.high %v216_v15, %v220_v16  ;;  %v223_v22 = vld [vmem:[%s7242_s1 + $0x5d0] sm:$0xff]  ;;  %v224_v24 = vld [vmem:[%s7242_s1 + $0x5d8] sm:$0xff]  ;;  %v4543_v26 = vcombine.low %v215_v13, %v219_v14  ;;  %v4545_v27 = vcombine.low %v216_v15, %v220_v16  ;;  %s5417_s22 = scalar_lea.vmem %s4355_s21, 32  ;;  %p5422_p1 = scmp.lt.s32.totalorder %s4355_s21, %s4355_s21 }
  0xd6   :  { %1816 = vmatpush1.bf16.msra.mxu0 %v4527_v9  ;;  %v227_v23 = vld [vmem:[%s7242_s1 + $0x5f0] sm:$0xff]  ;;  %v228_v25 = vld [vmem:[%s7242_s1 + $0x5f8] sm:$0xff]  ;;  %p5418_p0 = scmp.ne.s32.totalorder %s4355_s21, %s5417_s22  ;;  %p5423_p2 = scmp.lt.s32.totalorder %s5417_s22, %s5417_s22 }
  0xd7   :  { %1898 = vmatpush1.bf16.msra.mxu1 %v4529_v10  ;;  %1817 = vmatprep.subr.bf16.mxu0 %v4536_v11  ;;  %v4552_v56 = vcombine.high %v223_v22, %v227_v23  ;;  %v4554_v59 = vcombine.high %v224_v24, %v228_v25  ;;  %v231_v28 = vld [vmem:[%s7242_s1 + $0x610] sm:$0xff]  ;;  %v232_v32 = vld [vmem:[%s7242_s1 + $0x618] sm:$0xff]  ;;  %v4551_v34 = vcombine.low %v223_v22, %v227_v23 }
  0xd8   :  { %1899 = vmatprep.subr.bf16.mxu1 %v4538_v12  ;;  %v235_v29 = vld [vmem:[%s7242_s1 + $0x630] sm:$0xff]  ;;  %v236_v33 = vld [vmem:[%s7242_s1 + $0x638] sm:$0xff]  ;;  %v4553_v35 = vcombine.low %v224_v24, %v228_v25  ;;  %p5424_p3 = por %p5423_p2, %p5422_p1 }
  0xd9   :  { %v4560_v36 = vcombine.high %v231_v28, %v235_v29  ;;  %v4562_v37 = vcombine.high %v232_v32, %v236_v33  ;;  %v239_v38 = vld [vmem:[%s7242_s1 + $0x650] sm:$0xff]  ;;  %v240_v40 = vld [vmem:[%s7242_s1 + $0x658] sm:$0xff]  ;;  %v4559_v42 = vcombine.low %v231_v28, %v235_v29  ;;  %v4561_v43 = vcombine.low %v232_v32, %v236_v33 }
  0xda   :  { %1818 = vmatpush1.bf16.msra.mxu0 %v4535_v17  ;;  %v243_v39 = vld [vmem:[%s7242_s1 + $0x670] sm:$0xff]  ;;  %v244_v41 = vld [vmem:[%s7242_s1 + $0x678] sm:$0xff]  ;;  %p5425_p4 = pnand %p5424_p3, %p5418_p0 }
  0xdb   :  { %1900 = vmatpush1.bf16.msra.mxu1 %v4537_v18  ;;  %1819 = vmatprep.subr.bf16.mxu0 %v4544_v19  ;;  %v4568_v44 = vcombine.high %v239_v38, %v243_v39  ;;  %v4570_v45 = vcombine.high %v240_v40, %v244_v41  ;;  %v247_v46 = vld [vmem:[%s7242_s1 + $0x690] sm:$0xff]  ;;  %v248_v49 = vld [vmem:[%s7242_s1 + $0x698] sm:$0xff]  ;;  %v4567_v51 = vcombine.low %v239_v38, %v243_v39 }
  0xdc   :  { %1901 = vmatprep.subr.bf16.mxu1 %v4546_v20  ;;  %v251_v48 = vld [vmem:[%s7242_s1 + $0x6b0] sm:$0xff]  ;;  %v252_v50 = vld [vmem:[%s7242_s1 + $0x6b8] sm:$0xff]  ;;  %v4569_v52 = vcombine.low %v240_v40, %v244_v41 }
  0xdd   :  { %v4576_v53 = vcombine.high %v247_v46, %v251_v48  ;;  %v4578_v54 = vcombine.high %v248_v49, %v252_v50  ;;  %v255_v21 = vld [vmem:[%s7242_s1 + $0x6d0] sm:$0xff]  ;;  %v256_v55 = vld [vmem:[%s7242_s1 + $0x6d8] sm:$0xff]  ;;  %v4575_v58 = vcombine.low %v247_v46, %v251_v48  ;;  %v4577_v60 = vcombine.low %v248_v49, %v252_v50 }
  0xde   :  { %1820 = vmatpush1.bf16.msra.mxu0 %v4543_v26  ;;  %v259_v3 = vld [vmem:[%s7242_s1 + $0x6f0] sm:$0xff]  ;;  %v260_v57 = vld [vmem:[%s7242_s1 + $0x6f8] sm:$0xff] }
  0xdf   :  { %1902 = vmatpush1.bf16.msra.mxu1 %v4545_v27  ;;  %1821 = vmatprep.subr.bf16.mxu0 %v4552_v56  ;;  %v4584_v61 = vcombine.high %v255_v21, %v259_v3  ;;  %v4586_v62 = vcombine.high %v256_v55, %v260_v57  ;;  %v263_v30 = vld [vmem:[%s7242_s1 + $0x710] sm:$0xff]  ;;  %v264_v0 = vld [vmem:[%s7242_s1 + $0x718] sm:$0xff]  ;;  %v4583_v2 = vcombine.low %v255_v21, %v259_v3 }
  0xe0   :  { %1903 = vmatprep.subr.bf16.mxu1 %v4554_v59  ;;  %v267_v63 = vld [vmem:[%s7242_s1 + $0x730] sm:$0xff]  ;;  %v268_v1 = vld [vmem:[%s7242_s1 + $0x738] sm:$0xff]  ;;  %v4585_v4 = vcombine.low %v256_v55, %v260_v57 }
  0xe1   :  { %v4592_v5 = vcombine.high %v263_v30, %v267_v63  ;;  %v4594_v6 = vcombine.high %v264_v0, %v268_v1  ;;  %v271_v7 = vld [vmem:[%s7242_s1 + $0x750] sm:$0xff]  ;;  %v272_v9 = vld [vmem:[%s7242_s1 + $0x758] sm:$0xff]  ;;  %v4591_v11 = vcombine.low %v263_v30, %v267_v63  ;;  %v4593_v12 = vcombine.low %v264_v0, %v268_v1 }
  0xe2   :  { %1822 = vmatpush1.bf16.msra.mxu0 %v4551_v34  ;;  %v275_v8 = vld [vmem:[%s7242_s1 + $0x770] sm:$0xff]  ;;  %v276_v10 = vld [vmem:[%s7242_s1 + $0x778] sm:$0xff] }
  0xe3   :  { %1904 = vmatpush1.bf16.msra.mxu1 %v4553_v35  ;;  %1823 = vmatprep.subr.bf16.mxu0 %v4560_v36  ;;  %v4600_v13 = vcombine.high %v271_v7, %v275_v8  ;;  %v4602_v14 = vcombine.high %v272_v9, %v276_v10  ;;  %v279_v15 = vld [vmem:[%s7242_s1 + $0x790] sm:$0xff]  ;;  %v280_v17 = vld [vmem:[%s7242_s1 + $0x798] sm:$0xff]  ;;  %v4599_v19 = vcombine.low %v271_v7, %v275_v8 }
  0xe4   :  { %1905 = vmatprep.subr.bf16.mxu1 %v4562_v37  ;;  %v283_v16 = vld [vmem:[%s7242_s1 + $0x7b0] sm:$0xff]  ;;  %v284_v18 = vld [vmem:[%s7242_s1 + $0x7b8] sm:$0xff]  ;;  %v4601_v20 = vcombine.low %v272_v9, %v276_v10 }
  0xe5   :  { %v4608_v22 = vcombine.high %v279_v15, %v283_v16  ;;  %v4610_v23 = vcombine.high %v280_v17, %v284_v18  ;;  %v287_v24 = vld [vmem:[%s7242_s1 + $0x7d0] sm:$0xff]  ;;  %v288_v26 = vld [vmem:[%s7242_s1 + $0x7d8] sm:$0xff]  ;;  %v4607_v56 = vcombine.low %v279_v15, %v283_v16  ;;  %v4609_v59 = vcombine.low %v280_v17, %v284_v18 }
  0xe6   :  { %1824 = vmatpush1.bf16.msra.mxu0 %v4559_v42  ;;  %v291_v25 = vld [vmem:[%s7242_s1 + $0x7f0] sm:$0xff]  ;;  %v292_v27 = vld [vmem:[%s7242_s1 + $0x7f8] sm:$0xff] }
  0xe7   :  { %1906 = vmatpush1.bf16.msra.mxu1 %v4561_v43  ;;  %1825 = vmatprep.subr.bf16.mxu0 %v4568_v44  ;;  %v4616_v28 = vcombine.high %v287_v24, %v291_v25  ;;  %v4618_v29 = vcombine.high %v288_v26, %v292_v27  ;;  %v4615_v32 = vcombine.low %v287_v24, %v291_v25  ;;  %v5001_v34 = vld [vmem:[%s7244_s3 + $0x4] ss:$16 sps:$4 sm:$0xff]   ;;  %v5004_v35 = vld [vmem:[%s7244_s3 + $0xc] ss:$16 sps:$4 sm:$0xff]   ;;  %v4999_v36 = vld [vmem:[%s7244_s3] ss:$16 sps:$4 sm:$0xff]  }
  0xe8   :  { %1907 = vmatprep.subr.bf16.mxu1 %v4570_v45  ;;  %v4617_v33 = vcombine.low %v288_v26, %v292_v27  ;;  %v5002_v37 = vld [vmem:[%s7244_s3 + $0x8] ss:$16 sps:$4 sm:$0xff]   ;;  %v5007_v38 = vld [vmem:[%s7244_s3 + $0x24] ss:$16 sps:$4 sm:$0xff]   ;;  %v5010_v39 = vld [vmem:[%s7244_s3 + $0x2c] ss:$16 sps:$4 sm:$0xff]  }
  0xe9   :  { %v5005_v40 = vld [vmem:[%s7244_s3 + $0x20] ss:$16 sps:$4 sm:$0xff]   ;;  %v5008_v41 = vld [vmem:[%s7244_s3 + $0x28] ss:$16 sps:$4 sm:$0xff]   ;;  %v5013_v42 = vld [vmem:[%s7244_s3 + $0x44] ss:$16 sps:$4 sm:$0xff]  }
  0xea   :  { %1826 = vmatpush1.bf16.msra.mxu0 %v4567_v51  ;;  %v5011_v43 = vld [vmem:[%s7244_s3 + $0x40] ss:$16 sps:$4 sm:$0xff]   ;;  %v5014_v44 = vld [vmem:[%s7244_s3 + $0x48] ss:$16 sps:$4 sm:$0xff]   ;;  %v5019_v45 = vld [vmem:[%s7244_s3 + $0x64] ss:$16 sps:$4 sm:$0xff]  }
  0xeb   :  { %1908 = vmatpush1.bf16.msra.mxu1 %v4569_v52  ;;  %1827 = vmatprep.subr.bf16.mxu0 %v4576_v53  ;;  %v5022_v46 = vld [vmem:[%s7244_s3 + $0x6c] ss:$16 sps:$4 sm:$0xff]   ;;  %v5017_v48 = vld [vmem:[%s7244_s3 + $0x60] ss:$16 sps:$4 sm:$0xff]   ;;  %v5020_v49 = vld [vmem:[%s7244_s3 + $0x68] ss:$16 sps:$4 sm:$0xff]  }
  0xec   :  { %1909 = vmatprep.subr.bf16.mxu1 %v4578_v54  ;;  %v5025_v50 = vld [vmem:[%s7244_s3 + $0x84] ss:$16 sps:$4 sm:$0xff]   ;;  %v5028_v51 = vld [vmem:[%s7244_s3 + $0x8c] ss:$16 sps:$4 sm:$0xff]   ;;  %v5023_v52 = vld [vmem:[%s7244_s3 + $0x80] ss:$16 sps:$4 sm:$0xff]  }
  0xed   :  { %v5026_v53 = vld [vmem:[%s7244_s3 + $0x88] ss:$16 sps:$4 sm:$0xff]   ;;  %v5031_v54 = vld [vmem:[%s7244_s3 + $0xa4] ss:$16 sps:$4 sm:$0xff]   ;;  %v5034_v21 = vld [vmem:[%s7244_s3 + $0xac] ss:$16 sps:$4 sm:$0xff]  }
  0xee   :  { %1828 = vmatpush1.bf16.msra.mxu0 %v4575_v58  ;;  %v5029_v3 = vld [vmem:[%s7244_s3 + $0xa0] ss:$16 sps:$4 sm:$0xff]   ;;  %v5032_v55 = vld [vmem:[%s7244_s3 + $0xa8] ss:$16 sps:$4 sm:$0xff]   ;;  %v5037_v57 = vld [vmem:[%s7244_s3 + $0xc4] ss:$16 sps:$4 sm:$0xff]  }
  0xef   :  { %1910 = vmatpush1.bf16.msra.mxu1 %v4577_v60  ;;  %1829 = vmatprep.subr.bf16.mxu0 %v4584_v61  ;;  %v5040_v58 = vld [vmem:[%s7244_s3 + $0xcc] ss:$16 sps:$4 sm:$0xff]   ;;  %v5035_v60 = vld [vmem:[%s7244_s3 + $0xc0] ss:$16 sps:$4 sm:$0xff]   ;;  %v5038_v61 = vld [vmem:[%s7244_s3 + $0xc8] ss:$16 sps:$4 sm:$0xff]  }
  0xf0   :  { %1911 = vmatprep.subr.bf16.mxu1 %v4586_v62  ;;  %v5043_v62 = vld [vmem:[%s7244_s3 + $0xe4] ss:$16 sps:$4 sm:$0xff]   ;;  %v5046_v30 = vld [vmem:[%s7244_s3 + $0xec] ss:$16 sps:$4 sm:$0xff]   ;;  %v5041_v63 = vld [vmem:[%s7244_s3 + $0xe0] ss:$16 sps:$4 sm:$0xff]  }
  0xf1   :  { %v5044_v0 = vld [vmem:[%s7244_s3 + $0xe8] ss:$16 sps:$4 sm:$0xff]   ;;  %v5049_v1 = vld [vmem:[%s7244_s3 + $0x104] ss:$16 sps:$4 sm:$0xff]   ;;  %v5058_v7 = vld [vmem:[%s7244_s3 + $0x12c] ss:$16 sps:$4 sm:$0xff]  }
  0xf2   :  { %1830 = vmatpush1.bf16.msra.mxu0 %v4583_v2  ;;  %v5052_v2 = vld [vmem:[%s7244_s3 + $0x10c] ss:$16 sps:$4 sm:$0xff]   ;;  %v5053_v8 = vld [vmem:[%s7244_s3 + $0x120] ss:$16 sps:$4 sm:$0xff]   ;;  %v5056_v9 = vld [vmem:[%s7244_s3 + $0x128] ss:$16 sps:$4 sm:$0xff]  }
  0xf3   :  { %1912 = vmatpush1.bf16.msra.mxu1 %v4585_v4  ;;  %1831 = vmatprep.subr.bf16.mxu0 %v4592_v5  ;;  %v5047_v4 = vld [vmem:[%s7244_s3 + $0x100] ss:$16 sps:$4 sm:$0xff]   ;;  %v5050_v5 = vld [vmem:[%s7244_s3 + $0x108] ss:$16 sps:$4 sm:$0xff]   ;;  %v5061_v10 = vld [vmem:[%s7244_s3 + $0x144] ss:$16 sps:$4 sm:$0xff]  }
  0xf4   :  { %1913 = vmatprep.subr.bf16.mxu1 %v4594_v6  ;;  %v5055_v6 = vld [vmem:[%s7244_s3 + $0x124] ss:$16 sps:$4 sm:$0xff]   ;;  %v5070_v15 = vld [vmem:[%s7244_s3 + $0x16c] ss:$16 sps:$4 sm:$0xff]   ;;  %v5065_v16 = vld [vmem:[%s7244_s3 + $0x160] ss:$16 sps:$4 sm:$0xff]  }
  0xf5   :  { %v5068_v17 = vld [vmem:[%s7244_s3 + $0x168] ss:$16 sps:$4 sm:$0xff]   ;;  %v5073_v18 = vld [vmem:[%s7244_s3 + $0x184] ss:$16 sps:$4 sm:$0xff]   ;;  %v5082_v24 = vld [vmem:[%s7244_s3 + $0x1ac] ss:$16 sps:$4 sm:$0xff]  }
  0xf6   :  { %1832 = vmatpush1.bf16.msra.mxu0 %v4591_v11  ;;  %v5064_v11 = vld [vmem:[%s7244_s3 + $0x14c] ss:$16 sps:$4 sm:$0xff]   ;;  %v5077_v25 = vld [vmem:[%s7244_s3 + $0x1a0] ss:$16 sps:$4 sm:$0xff]   ;;  %v5080_v26 = vld [vmem:[%s7244_s3 + $0x1a8] ss:$16 sps:$4 sm:$0xff]  }
  0xf7   :  { %1914 = vmatpush1.bf16.msra.mxu1 %v4593_v12  ;;  %1833 = vmatprep.subr.bf16.mxu0 %v4600_v13  ;;  %v5059_v12 = vld [vmem:[%s7244_s3 + $0x140] ss:$16 sps:$4 sm:$0xff]   ;;  %v5062_v13 = vld [vmem:[%s7244_s3 + $0x148] ss:$16 sps:$4 sm:$0xff]   ;;  %v5085_v27 = vld [vmem:[%s7244_s3 + $0x1c4] ss:$16 sps:$4 sm:$0xff]  }
  0xf8   :  { %1915 = vmatprep.subr.bf16.mxu1 %v4602_v14  ;;  %v5067_v14 = vld [vmem:[%s7244_s3 + $0x164] ss:$16 sps:$4 sm:$0xff]  }
  0xfa   :  { %1834 = vmatpush1.bf16.msra.mxu0 %v4599_v19  ;;  %v5076_v19 = vld [vmem:[%s7244_s3 + $0x18c] ss:$16 sps:$4 sm:$0xff]  }
  0xfb   :  { %1916 = vmatpush1.bf16.msra.mxu1 %v4601_v20  ;;  %1835 = vmatprep.subr.bf16.mxu0 %v4608_v22  ;;  %v5071_v20 = vld [vmem:[%s7244_s3 + $0x180] ss:$16 sps:$4 sm:$0xff]   ;;  %v5074_v22 = vld [vmem:[%s7244_s3 + $0x188] ss:$16 sps:$4 sm:$0xff]  }
  0xfc   :  { %1917 = vmatprep.subr.bf16.mxu1 %v4610_v23  ;;  %v5079_v23 = vld [vmem:[%s7244_s3 + $0x1a4] ss:$16 sps:$4 sm:$0xff]  }
  0xfe   :  { %1836 = vmatpush1.bf16.msra.mxu0 %v4607_v56  ;;  %v5088_v56 = vld [vmem:[%s7244_s3 + $0x1cc] ss:$16 sps:$4 sm:$0xff]  }
  0xff   :  { %1918 = vmatpush1.bf16.msra.mxu1 %v4609_v59  ;;  %1837 = vmatprep.subr.bf16.mxu0 %v4616_v28  ;;  %v5083_v59 = vld [vmem:[%s7244_s3 + $0x1c0] ss:$16 sps:$4 sm:$0xff]   ;;  %v5086_v28 = vld [vmem:[%s7244_s3 + $0x1c8] ss:$16 sps:$4 sm:$0xff]  }
 0x100   :  { %1919 = vmatprep.subr.bf16.mxu1 %v4618_v29  ;;  %v5091_v29 = vld [vmem:[%s7244_s3 + $0x1e4] ss:$16 sps:$4 sm:$0xff]  }
 0x102   :  { %1838 = vmatpush1.bf16.msra.mxu0 %v4615_v32  ;;  %v5094_v32 = vld [vmem:[%s7244_s3 + $0x1ec] ss:$16 sps:$4 sm:$0xff]  }
 0x103   :  { %1920 = vmatpush1.bf16.msra.mxu1 %v4617_v33  ;;  %3667 = vmatprep.subr.bf16.mxu0 %v5001_v34  ;;  %v5089_v33 = vld [vmem:[%s7244_s3 + $0x1e0] ss:$16 sps:$4 sm:$0xff]   ;;  %v5092_v34 = vld [vmem:[%s7244_s3 + $0x1e8] ss:$16 sps:$4 sm:$0xff]  }
 0x104   :  { %3831 = vmatprep.subr.bf16.mxu1 %v5004_v35  ;;  %v5097_v35 = vld [vmem:[%s7244_s3 + $0x204] ss:$16 sps:$4 sm:$0xff]  }
 0x105   :  { %1840 = vmatmul.mubr.bf16.vlgmr.msra.gmra.mrb[4].mxu0 %v5923_v31 }
 0x106   :  { %1922 = vmatmul.mubr.bf16.vlgmr.msra.gmra.mrb[4].mxu1 %v5923_v31  ;;  %3668 = vmatpush1.bf16.msra.mxu0 %v4999_v36  ;;  %v5016_v31 = vld [vmem:[%s7244_s3 + $0x4c] ss:$16 sps:$4 sm:$0xff]  }
 0x107   :  { %3832 = vmatpush1.bf16.msra.mxu1 %v5002_v37  ;;  %3669 = vmatprep.subr.bf16.mxu0 %v5007_v38  ;;  %v5100_v36 = vld [vmem:[%s7244_s3 + $0x20c] ss:$16 sps:$4 sm:$0xff]   ;;  %v5442_v37 = vmov 1983009808  }
 0x108   :  { %3833 = vmatprep.subr.bf16.mxu1 %v5010_v39  ;;  %v1941_v38 = vunpack.c.l.s4 %v5442_v37  ;;  %v1987_v39 = vsub.s32 0, %v5556_v47  ;;  %v5133_v37 = vld [vmem:[%s7244_s3 + $0x2c4] ss:$16 sps:$4 sm:$0xff]  }
 0x10a   :  { %3670 = vmatpush1.bf16.msra.mxu0 %v5005_v40  ;;  %v1991_v40 = vsub.s32 1, %v5556_v47 }
 0x10b   :  { %3834 = vmatpush1.bf16.msra.mxu1 %v5008_v41  ;;  %3671 = vmatprep.subr.bf16.mxu0 %v5013_v42  ;;  %v1995_v41 = vsub.s32 2, %v5556_v47  ;;  %v1999_v42 = vsub.s32 3, %v5556_v47 }
 0x10c   :  { %3835 = vmatprep.subr.bf16.mxu1 %v5016_v31  ;;  %v6500_v31 = vld [vmem:[%s7243_s2] sm:$0xff] }
 0x10e   :  { %3672 = vmatpush1.bf16.msra.mxu0 %v5011_v43  ;;  %v1942_v43 = vunpack.c.0.s8 %v1941_v38  ;;  %v5136_v38 = vld [vmem:[%s7244_s3 + $0x2cc] ss:$16 sps:$4 sm:$0xff]  }
 0x10f   :  { %3836 = vmatpush1.bf16.msra.mxu1 %v5014_v44  ;;  %3673 = vmatprep.subr.bf16.mxu0 %v5019_v45  ;;  %v1988_v44 = vrot.slane %v6500_v31, %v1987_v39  ;;  %v1992_v45 = vrot.slane %v6500_v31, %v1991_v40 }
 0x110   :  { %3837 = vmatprep.subr.bf16.mxu1 %v5022_v46  ;;  %v1996_v46 = vrot.slane %v6500_v31, %v1995_v41 }
 0x112   :  { %3674 = vmatpush1.bf16.msra.mxu0 %v5017_v48  ;;  %v2000_v48 = vrot.slane %v6500_v31, %v1999_v42 }
 0x113   :  { %3838 = vmatpush1.bf16.msra.mxu1 %v5020_v49  ;;  %3675 = vmatprep.subr.bf16.mxu0 %v5025_v50  ;;  %v6515_v49 = vsub.s32 %v1942_v43, %v5556_v47  ;;  %v2017_v50 = vcombine.low %v1988_v44, %v1992_v45  ;;  %v5131_v43 = vld [vmem:[%s7244_s3 + $0x2c0] ss:$16 sps:$4 sm:$0xff]   ;;  %v5134_v44 = vld [vmem:[%s7244_s3 + $0x2c8] ss:$16 sps:$4 sm:$0xff]   ;;  %v5139_v45 = vld [vmem:[%s7244_s3 + $0x2e4] ss:$16 sps:$4 sm:$0xff]  }
 0x114   :  { %3839 = vmatprep.subr.bf16.mxu1 %v5028_v51  ;;  %v2018_v51 = vcombine.low %v1996_v46, %v2000_v48  ;;  %v5142_v46 = vld [vmem:[%s7244_s3 + $0x2ec] ss:$16 sps:$4 sm:$0xff]   ;;  %v5137_v48 = vld [vmem:[%s7244_s3 + $0x2e0] ss:$16 sps:$4 sm:$0xff]  }
 0x116   :  { %3676 = vmatpush1.bf16.msra.mxu0 %v5023_v52 }
 0x117   :  { %3840 = vmatpush1.bf16.msra.mxu1 %v5026_v53  ;;  %3677 = vmatprep.subr.bf16.mxu0 %v5031_v54 }
 0x118   :  { %3841 = vmatprep.subr.bf16.mxu1 %v5034_v21  ;;  %v2025_v21 = vrot.slane %v2017_v50, %v6515_v49  ;;  %v5140_v50 = vld [vmem:[%s7244_s3 + $0x2e8] ss:$16 sps:$4 sm:$0xff]  }
 0x11a   :  { %3678 = vmatpush1.bf16.msra.mxu0 %v5029_v3  ;;  %v2032_v3 = vrot.slane %v2018_v51, %v6515_v49  ;;  %v5145_v51 = vld [vmem:[%s7244_s3 + $0x304] ss:$16 sps:$4 sm:$0xff]  }
 0x11b   :  { %3842 = vmatpush1.bf16.msra.mxu1 %v5032_v55  ;;  %3679 = vmatprep.subr.bf16.mxu0 %v5037_v57 }
 0x11c   :  { %3843 = vmatprep.subr.bf16.mxu1 %v5040_v58 }
 0x11e   :  { %3680 = vmatpush1.bf16.msra.mxu0 %v5035_v60 }
 0x11f   :  { %3844 = vmatpush1.bf16.msra.mxu1 %v5038_v61  ;;  %3681 = vmatprep.subr.bf16.mxu0 %v5043_v62 }
 0x120   :  { %3845 = vmatprep.subr.bf16.mxu1 %v5046_v30 }
 0x122   :  { %3682 = vmatpush1.bf16.msra.mxu0 %v5041_v63 }
 0x123   :  { %3846 = vmatpush1.bf16.msra.mxu1 %v5044_v0  ;;  %3683 = vmatprep.subr.bf16.mxu0 %v5049_v1  ;;  %v2033_v1 = vcombine.low %v2025_v21, %v2032_v3  ;;  %v5151_v21 = vld [vmem:[%s7244_s3 + $0x324] ss:$16 sps:$4 sm:$0xff]   ;;  %v5154_v3 = vld [vmem:[%s7244_s3 + $0x32c] ss:$16 sps:$4 sm:$0xff]  }
 0x124   :  { %3847 = vmatprep.subr.bf16.mxu1 %v5052_v2 }
 0x126   :  { %3684 = vmatpush1.bf16.msra.mxu0 %v5047_v4 }
 0x127   :  { %3848 = vmatpush1.bf16.msra.mxu1 %v5050_v5  ;;  %3685 = vmatprep.subr.bf16.mxu0 %v5055_v6 }
 0x128   :  { %3849 = vmatprep.subr.bf16.mxu1 %v5058_v7 }
 0x12a   :  { %3686 = vmatpush1.bf16.msra.mxu0 %v5053_v8 }
 0x12b   :  { %3850 = vmatpush1.bf16.msra.mxu1 %v5056_v9  ;;  %3687 = vmatprep.subr.bf16.mxu0 %v5061_v10 }
 0x12c   :  { %3851 = vmatprep.subr.bf16.mxu1 %v5064_v11  ;;  %v5095_v11 = vld [vmem:[%s7244_s3 + $0x200] ss:$16 sps:$4 sm:$0xff]  }
 0x12e   :  { %3688 = vmatpush1.bf16.msra.mxu0 %v5059_v12  ;;  %v5098_v12 = vld [vmem:[%s7244_s3 + $0x208] ss:$16 sps:$4 sm:$0xff]  }
 0x12f   :  { %3852 = vmatpush1.bf16.msra.mxu1 %v5062_v13  ;;  %3689 = vmatprep.subr.bf16.mxu0 %v5067_v14 }
 0x130   :  { %3853 = vmatprep.subr.bf16.mxu1 %v5070_v15 }
 0x132   :  { %3690 = vmatpush1.bf16.msra.mxu0 %v5065_v16  ;;  %v5103_v16 = vld [vmem:[%s7244_s3 + $0x224] ss:$16 sps:$4 sm:$0xff]  }
 0x133   :  { %3854 = vmatpush1.bf16.msra.mxu1 %v5068_v17  ;;  %3691 = vmatprep.subr.bf16.mxu0 %v5073_v18  ;;  %v5106_v17 = vld [vmem:[%s7244_s3 + $0x22c] ss:$16 sps:$4 sm:$0xff]   ;;  %v5101_v18 = vld [vmem:[%s7244_s3 + $0x220] ss:$16 sps:$4 sm:$0xff]  }
 0x134   :  { %3855 = vmatprep.subr.bf16.mxu1 %v5076_v19  ;;  %v5104_v19 = vld [vmem:[%s7244_s3 + $0x228] ss:$16 sps:$4 sm:$0xff]  }
 0x136   :  { %3692 = vmatpush1.bf16.msra.mxu0 %v5071_v20  ;;  %v5109_v20 = vld [vmem:[%s7244_s3 + $0x244] ss:$16 sps:$4 sm:$0xff]  }
 0x137   :  { %3856 = vmatpush1.bf16.msra.mxu1 %v5074_v22  ;;  %3693 = vmatprep.subr.bf16.mxu0 %v5079_v23  ;;  %v5112_v22 = vld [vmem:[%s7244_s3 + $0x24c] ss:$16 sps:$4 sm:$0xff]   ;;  %v5107_v23 = vld [vmem:[%s7244_s3 + $0x240] ss:$16 sps:$4 sm:$0xff]  }
 0x138   :  { %3857 = vmatprep.subr.bf16.mxu1 %v5082_v24  ;;  %v5110_v24 = vld [vmem:[%s7244_s3 + $0x248] ss:$16 sps:$4 sm:$0xff]  }
 0x13a   :  { %3694 = vmatpush1.bf16.msra.mxu0 %v5077_v25  ;;  %v5115_v25 = vld [vmem:[%s7244_s3 + $0x264] ss:$16 sps:$4 sm:$0xff]  }
 0x13b   :  { %3858 = vmatpush1.bf16.msra.mxu1 %v5080_v26  ;;  %3695 = vmatprep.subr.bf16.mxu0 %v5085_v27  ;;  %v5118_v26 = vld [vmem:[%s7244_s3 + $0x26c] ss:$16 sps:$4 sm:$0xff]   ;;  %v5113_v27 = vld [vmem:[%s7244_s3 + $0x260] ss:$16 sps:$4 sm:$0xff]  }
 0x13c   :  { %3859 = vmatprep.subr.bf16.mxu1 %v5088_v56  ;;  %v5116_v56 = vld [vmem:[%s7244_s3 + $0x268] ss:$16 sps:$4 sm:$0xff]  }
 0x13e   :  { %3696 = vmatpush1.bf16.msra.mxu0 %v5083_v59  ;;  %v5121_v59 = vld [vmem:[%s7244_s3 + $0x284] ss:$16 sps:$4 sm:$0xff]  }
 0x13f   :  { %3860 = vmatpush1.bf16.msra.mxu1 %v5086_v28  ;;  %3697 = vmatprep.subr.bf16.mxu0 %v5091_v29  ;;  %v5124_v28 = vld [vmem:[%s7244_s3 + $0x28c] ss:$16 sps:$4 sm:$0xff]   ;;  %v5119_v29 = vld [vmem:[%s7244_s3 + $0x280] ss:$16 sps:$4 sm:$0xff]  }
 0x140   :  { %3861 = vmatprep.subr.bf16.mxu1 %v5094_v32  ;;  %v5122_v32 = vld [vmem:[%s7244_s3 + $0x288] ss:$16 sps:$4 sm:$0xff]  }
 0x142   :  { %3698 = vmatpush1.bf16.msra.mxu0 %v5089_v33  ;;  %v5127_v33 = vld [vmem:[%s7244_s3 + $0x2a4] ss:$16 sps:$4 sm:$0xff]  }
 0x143   :  { %3862 = vmatpush1.bf16.msra.mxu1 %v5092_v34  ;;  %3708 = vmatprep.subr.bf16.mxu0 %v5097_v35  ;;  %v5130_v34 = vld [vmem:[%s7244_s3 + $0x2ac] ss:$16 sps:$4 sm:$0xff]   ;;  %v5125_v35 = vld [vmem:[%s7244_s3 + $0x2a0] ss:$16 sps:$4 sm:$0xff]  }
 0x144   :  { %3872 = vmatprep.subr.bf16.mxu1 %v5100_v36  ;;  %v5128_v36 = vld [vmem:[%s7244_s3 + $0x2a8] ss:$16 sps:$4 sm:$0xff]  }
 0x158   :  { %v1677_v52 = vpop.f32.mrb[0].mxu0  ;;  %v1759_v53 = vpop.f32.mrb[0].mxu1 }
 0x159   :  { %v1679_v54 = vpop.f32.mrb[1].mxu0  ;;  %v1761_v57 = vpop.f32.mrb[1].mxu1 }
 0x15a   :  { %v1938_v55 = vcombine.low %v1677_v52, %v1679_v54  ;;  %v1681_v58 = vpop.f32.mrb[2].mxu0  ;;  %v1939_v60 = vcombine.low %v1759_v53, %v1761_v57  ;;  %v1763_v61 = vpop.f32.mrb[2].mxu1  ;;  %v5148_v52 = vld [vmem:[%s7244_s3 + $0x30c] ss:$16 sps:$4 sm:$0xff]   ;;  %v5143_v53 = vld [vmem:[%s7244_s3 + $0x300] ss:$16 sps:$4 sm:$0xff]  }
 0x15b   :  { %v1682_v62 = vpop.f32.mrb[3].mxu0  ;;  %v1764_v63 = vpop.f32.mrb[3].mxu1  ;;  %v5146_v54 = vld [vmem:[%s7244_s3 + $0x308] ss:$16 sps:$4 sm:$0xff]   ;;  %v5157_v58 = vld [vmem:[%s7244_s3 + $0x344] ss:$16 sps:$4 sm:$0xff]  }
 0x15c   :  { %v1946_v30 = vrot.slane %v1938_v55, %v6515_v49  ;;  %v1953_v0 = vrot.slane %v1939_v60, %v6515_v49  ;;  %v5149_v55 = vld [vmem:[%s7244_s3 + $0x320] ss:$16 sps:$4 sm:$0xff]   ;;  %v5152_v57 = vld [vmem:[%s7244_s3 + $0x328] ss:$16 sps:$4 sm:$0xff]   ;;  %v5160_v60 = vld [vmem:[%s7244_s3 + $0x34c] ss:$16 sps:$4 sm:$0xff]  }
 0x15d   :  { %v5155_v61 = vld [vmem:[%s7244_s3 + $0x340] ss:$16 sps:$4 sm:$0xff]   ;;  %v5158_v62 = vld [vmem:[%s7244_s3 + $0x348] ss:$16 sps:$4 sm:$0xff]   ;;  %v5166_v63 = vld [vmem:[%s7244_s3 + $0x36c] ss:$16 sps:$4 sm:$0xff]  }
 0x15e   :  { %v1954_v2 = vcombine.low %v1946_v30, %v1953_v0  ;;  %v5163_v30 = vld [vmem:[%s7244_s3 + $0x364] ss:$16 sps:$4 sm:$0xff]   ;;  %v5161_v0 = vld [vmem:[%s7244_s3 + $0x360] ss:$16 sps:$4 sm:$0xff]  }
 0x160   :  { %v2053_v4 = vadd.f32 %v2033_v1, %v1954_v2  ;;  %v5164_v1 = vld [vmem:[%s7244_s3 + $0x368] ss:$16 sps:$4 sm:$0xff]   ;;  %v5169_v2 = vld [vmem:[%s7244_s3 + $0x384] ss:$16 sps:$4 sm:$0xff]  }
 0x162   :  { %v2055_v5 = vmax.f32 %v2053_v4, 0.0  ;;  %v5172_v4 = vld [vmem:[%s7244_s3 + $0x38c] ss:$16 sps:$4 sm:$0xff]  }
 0x164   :  { %v2066_v6 = vrot.slane %v2055_v5, %v6515_v49  ;;  %v2059_v7 = vcombine.high %v2055_v5, %v2055_v5  ;;  %v5167_v5 = vld [vmem:[%s7244_s3 + $0x380] ss:$16 sps:$4 sm:$0xff]  }
 0x166   :  { %v2074_v8 = vcombine.high %v2066_v6, %v2066_v6  ;;  %v6523_v9 = vrot.slane %v2059_v7, %v6515_v49  ;;  %v2101_v14 = vpack.c.bf16 %v2066_v6, %v2066_v6  ;;  %v5170_v6 = vld [vmem:[%s7244_s3 + $0x388] ss:$16 sps:$4 sm:$0xff]   ;;  %v5175_v7 = vld [vmem:[%s7244_s3 + $0x3a4] ss:$16 sps:$4 sm:$0xff]  }
 0x168   :  { %v2102_v10 = vpack.c.bf16 %v2074_v8, %v2074_v8  ;;  %v2075_v13 = vcombine.high %v6523_v9, %v6523_v9  ;;  %v5178_v8 = vld [vmem:[%s7244_s3 + $0x3ac] ss:$16 sps:$4 sm:$0xff]  }
 0x16a   :  { %3699 = vmatprep.mubr.bf16.mxu0 %v2102_v10  ;;  %3863 = vmatprep.mubr.bf16.mxu1 %v2102_v10  ;;  %v2104_v15 = vpack.c.bf16 %v2075_v13, %v2075_v13  ;;  %v5173_v10 = vld [vmem:[%s7244_s3 + $0x3a0] ss:$16 sps:$4 sm:$0xff]   ;;  %v5184_v13 = vld [vmem:[%s7244_s3 + $0x3cc] ss:$16 sps:$4 sm:$0xff]  }
 0x16b   :  { %3700 = vmatmul.mubr.bf16.vlgmr.msra.gmra.mrb[8].mxu0 %v2101_v14  ;;  %3864 = vmatmul.mubr.bf16.vlgmr.msra.gmra.mrb[8].mxu1 %v2101_v14  ;;  %v5179_v14 = vld [vmem:[%s7244_s3 + $0x3c0] ss:$16 sps:$4 sm:$0xff]  }
 0x16c   :  { %3709 = vmatpush1.bf16.msra.mxu0 %v5095_v11  ;;  %3873 = vmatpush1.bf16.msra.mxu1 %v5098_v12  ;;  %v5176_v11 = vld [vmem:[%s7244_s3 + $0x3a8] ss:$16 sps:$4 sm:$0xff]   ;;  %v5181_v12 = vld [vmem:[%s7244_s3 + $0x3c4] ss:$16 sps:$4 sm:$0xff]  }
 0x16d   :  { %3740 = vmatprep.mubr.bf16.mxu0 %v2104_v15  ;;  %3904 = vmatprep.mubr.bf16.mxu1 %v2104_v15  ;;  %v5182_v15 = vld [vmem:[%s7244_s3 + $0x3c8] ss:$16 sps:$4 sm:$0xff]  }
 0x16e   :  { %3710 = vmatprep.subr.bf16.mxu0 %v5103_v16  ;;  %3874 = vmatprep.subr.bf16.mxu1 %v5106_v17  ;;  %v5187_v16 = vld [vmem:[%s7244_s3 + $0x3e4] ss:$16 sps:$4 sm:$0xff]   ;;  %v5190_v17 = vld [vmem:[%s7244_s3 + $0x3ec] ss:$16 sps:$4 sm:$0xff]  }
 0x170   :  { %3711 = vmatpush1.bf16.msra.mxu0 %v5101_v18  ;;  %3875 = vmatpush1.bf16.msra.mxu1 %v5104_v19  ;;  %v5185_v18 = vld [vmem:[%s7244_s3 + $0x3e0] ss:$16 sps:$4 sm:$0xff]   ;;  %v5188_v19 = vld [vmem:[%s7244_s3 + $0x3e8] ss:$16 sps:$4 sm:$0xff]  }
 0x171   :  { %3712 = vmatprep.subr.bf16.mxu0 %v5109_v20  ;;  %3876 = vmatprep.subr.bf16.mxu1 %v5112_v22  ;;  %v5193_v20 = vld [vmem:[%s7244_s3 + $0x404] ss:$16 sps:$4 sm:$0xff]   ;;  %v5196_v22 = vld [vmem:[%s7244_s3 + $0x40c] ss:$16 sps:$4 sm:$0xff]  }
 0x174   :  { %3713 = vmatpush1.bf16.msra.mxu0 %v5107_v23  ;;  %3877 = vmatpush1.bf16.msra.mxu1 %v5110_v24  ;;  %v5191_v23 = vld [vmem:[%s7244_s3 + $0x400] ss:$16 sps:$4 sm:$0xff]   ;;  %v5194_v24 = vld [vmem:[%s7244_s3 + $0x408] ss:$16 sps:$4 sm:$0xff]  }
 0x175   :  { %3714 = vmatprep.subr.bf16.mxu0 %v5115_v25  ;;  %3878 = vmatprep.subr.bf16.mxu1 %v5118_v26  ;;  %v2103_v25 = vpack.c.bf16 %v6523_v9, %v6523_v9  ;;  %v5199_v26 = vld [vmem:[%s7244_s3 + $0x424] ss:$16 sps:$4 sm:$0xff]   ;;  %v5200_v9 = vld [vmem:[%s7244_s3 + $0x428] ss:$16 sps:$4 sm:$0xff]  }
 0x178   :  { %3715 = vmatpush1.bf16.msra.mxu0 %v5113_v27  ;;  %3879 = vmatpush1.bf16.msra.mxu1 %v5116_v56  ;;  %v5202_v27 = vld [vmem:[%s7244_s3 + $0x42c] ss:$16 sps:$4 sm:$0xff]   ;;  %v5197_v56 = vld [vmem:[%s7244_s3 + $0x420] ss:$16 sps:$4 sm:$0xff]  }
 0x179   :  { %3716 = vmatprep.subr.bf16.mxu0 %v5121_v59  ;;  %3880 = vmatprep.subr.bf16.mxu1 %v5124_v28  ;;  %v5205_v59 = vld [vmem:[%s7244_s3 + $0x444] ss:$16 sps:$4 sm:$0xff]   ;;  %v5208_v28 = vld [vmem:[%s7244_s3 + $0x44c] ss:$16 sps:$4 sm:$0xff]  }
 0x17c   :  { %3717 = vmatpush1.bf16.msra.mxu0 %v5119_v29  ;;  %3881 = vmatpush1.bf16.msra.mxu1 %v5122_v32  ;;  %v5203_v29 = vld [vmem:[%s7244_s3 + $0x440] ss:$16 sps:$4 sm:$0xff]   ;;  %v5206_v32 = vld [vmem:[%s7244_s3 + $0x448] ss:$16 sps:$4 sm:$0xff]  }
 0x17d   :  { %3718 = vmatprep.subr.bf16.mxu0 %v5127_v33  ;;  %3882 = vmatprep.subr.bf16.mxu1 %v5130_v34  ;;  %v5211_v33 = vld [vmem:[%s7244_s3 + $0x464] ss:$16 sps:$4 sm:$0xff]   ;;  %v5214_v34 = vld [vmem:[%s7244_s3 + $0x46c] ss:$16 sps:$4 sm:$0xff]  }
 0x180   :  { %3719 = vmatpush1.bf16.msra.mxu0 %v5125_v35  ;;  %3883 = vmatpush1.bf16.msra.mxu1 %v5128_v36  ;;  %v5209_v35 = vld [vmem:[%s7244_s3 + $0x460] ss:$16 sps:$4 sm:$0xff]   ;;  %v5212_v36 = vld [vmem:[%s7244_s3 + $0x468] ss:$16 sps:$4 sm:$0xff]  }
 0x181   :  { %3720 = vmatprep.subr.bf16.mxu0 %v5133_v37  ;;  %3884 = vmatprep.subr.bf16.mxu1 %v5136_v38  ;;  %v5217_v37 = vld [vmem:[%s7244_s3 + $0x484] ss:$16 sps:$4 sm:$0xff]   ;;  %v5220_v38 = vld [vmem:[%s7244_s3 + $0x48c] ss:$16 sps:$4 sm:$0xff]  }
 0x184   :  { %3721 = vmatpush1.bf16.msra.mxu0 %v5131_v43  ;;  %3885 = vmatpush1.bf16.msra.mxu1 %v5134_v44  ;;  %v5215_v43 = vld [vmem:[%s7244_s3 + $0x480] ss:$16 sps:$4 sm:$0xff]   ;;  %v5218_v44 = vld [vmem:[%s7244_s3 + $0x488] ss:$16 sps:$4 sm:$0xff]  }
 0x185   :  { %3722 = vmatprep.subr.bf16.mxu0 %v5139_v45  ;;  %3886 = vmatprep.subr.bf16.mxu1 %v5142_v46  ;;  %v5223_v45 = vld [vmem:[%s7244_s3 + $0x4a4] ss:$16 sps:$4 sm:$0xff]   ;;  %v5226_v46 = vld [vmem:[%s7244_s3 + $0x4ac] ss:$16 sps:$4 sm:$0xff]  }
 0x188   :  { %3723 = vmatpush1.bf16.msra.mxu0 %v5137_v48  ;;  %3887 = vmatpush1.bf16.msra.mxu1 %v5140_v50  ;;  %v5221_v48 = vld [vmem:[%s7244_s3 + $0x4a0] ss:$16 sps:$4 sm:$0xff]   ;;  %v5224_v50 = vld [vmem:[%s7244_s3 + $0x4a8] ss:$16 sps:$4 sm:$0xff]  }
 0x189   :  { %3724 = vmatprep.subr.bf16.mxu0 %v5145_v51  ;;  %3888 = vmatprep.subr.bf16.mxu1 %v5148_v52  ;;  %v5229_v51 = vld [vmem:[%s7244_s3 + $0x4c4] ss:$16 sps:$4 sm:$0xff]   ;;  %v5232_v52 = vld [vmem:[%s7244_s3 + $0x4cc] ss:$16 sps:$4 sm:$0xff]  }
 0x18c   :  { %3725 = vmatpush1.bf16.msra.mxu0 %v5143_v53  ;;  %3889 = vmatpush1.bf16.msra.mxu1 %v5146_v54  ;;  %v5227_v53 = vld [vmem:[%s7244_s3 + $0x4c0] ss:$16 sps:$4 sm:$0xff]   ;;  %v5230_v54 = vld [vmem:[%s7244_s3 + $0x4c8] ss:$16 sps:$4 sm:$0xff]  }
 0x18d   :  { %3726 = vmatprep.subr.bf16.mxu0 %v5151_v21  ;;  %3890 = vmatprep.subr.bf16.mxu1 %v5154_v3  ;;  %v5235_v21 = vld [vmem:[%s7244_s3 + $0x4e4] ss:$16 sps:$4 sm:$0xff]   ;;  %v5238_v3 = vld [vmem:[%s7244_s3 + $0x4ec] ss:$16 sps:$4 sm:$0xff]  }
 0x190   :  { %3727 = vmatpush1.bf16.msra.mxu0 %v5149_v55  ;;  %3891 = vmatpush1.bf16.msra.mxu1 %v5152_v57  ;;  %v5233_v55 = vld [vmem:[%s7244_s3 + $0x4e0] ss:$16 sps:$4 sm:$0xff]   ;;  %v5236_v57 = vld [vmem:[%s7244_s3 + $0x4e8] ss:$16 sps:$4 sm:$0xff]  }
 0x191   :  { %3728 = vmatprep.subr.bf16.mxu0 %v5157_v58  ;;  %3892 = vmatprep.subr.bf16.mxu1 %v5160_v60  ;;  %v5241_v58 = vld [vmem:[%s7244_s3 + $0x504] ss:$16 sps:$4 sm:$0xff]   ;;  %v5244_v60 = vld [vmem:[%s7244_s3 + $0x50c] ss:$16 sps:$4 sm:$0xff]  }
 0x194   :  { %3729 = vmatpush1.bf16.msra.mxu0 %v5155_v61  ;;  %3893 = vmatpush1.bf16.msra.mxu1 %v5158_v62  ;;  %v5239_v61 = vld [vmem:[%s7244_s3 + $0x500] ss:$16 sps:$4 sm:$0xff]   ;;  %v5242_v62 = vld [vmem:[%s7244_s3 + $0x508] ss:$16 sps:$4 sm:$0xff]  }
 0x195   :  { %3730 = vmatprep.subr.bf16.mxu0 %v5163_v30  ;;  %3894 = vmatprep.subr.bf16.mxu1 %v5166_v63  ;;  %v5247_v30 = vld [vmem:[%s7244_s3 + $0x524] ss:$16 sps:$4 sm:$0xff]   ;;  %v5250_v63 = vld [vmem:[%s7244_s3 + $0x52c] ss:$16 sps:$4 sm:$0xff]  }
 0x198   :  { %3731 = vmatpush1.bf16.msra.mxu0 %v5161_v0  ;;  %3895 = vmatpush1.bf16.msra.mxu1 %v5164_v1  ;;  %v5245_v0 = vld [vmem:[%s7244_s3 + $0x520] ss:$16 sps:$4 sm:$0xff]   ;;  %v2003_v1 = vsub.s32 4, %v5556_v47 }
 0x199   :  { %3732 = vmatprep.subr.bf16.mxu0 %v5169_v2  ;;  %3896 = vmatprep.subr.bf16.mxu1 %v5172_v4  ;;  %v5248_v2 = vld [vmem:[%s7244_s3 + $0x528] ss:$16 sps:$4 sm:$0xff]   ;;  %v2007_v4 = vsub.s32 5, %v5556_v47 }
 0x19c   :  { %3733 = vmatpush1.bf16.msra.mxu0 %v5167_v5  ;;  %3897 = vmatpush1.bf16.msra.mxu1 %v5170_v6  ;;  %v2011_v5 = vsub.s32 6, %v5556_v47  ;;  %v2015_v6 = vsub.s32 7, %v5556_v47 }
 0x19d   :  { %3734 = vmatprep.subr.bf16.mxu0 %v5175_v7  ;;  %3898 = vmatprep.subr.bf16.mxu1 %v5178_v8  ;;  %v5253_v7 = vld [vmem:[%s7244_s3 + $0x544] ss:$16 sps:$4 sm:$0xff]   ;;  %v5256_v8 = vld [vmem:[%s7244_s3 + $0x54c] ss:$16 sps:$4 sm:$0xff]  }
 0x1a0   :  { %3735 = vmatpush1.bf16.msra.mxu0 %v5173_v10  ;;  %3899 = vmatpush1.bf16.msra.mxu1 %v5176_v11  ;;  %v2004_v10 = vrot.slane %v6500_v31, %v2003_v1  ;;  %v5251_v11 = vld [vmem:[%s7244_s3 + $0x540] ss:$16 sps:$4 sm:$0xff]  }
 0x1a1   :  { %3736 = vmatprep.subr.bf16.mxu0 %v5181_v12  ;;  %3900 = vmatprep.subr.bf16.mxu1 %v5184_v13  ;;  %v5254_v12 = vld [vmem:[%s7244_s3 + $0x548] ss:$16 sps:$4 sm:$0xff]   ;;  %v2008_v13 = vrot.slane %v6500_v31, %v2007_v4  ;;  %v5287_v4 = vld [vmem:[%s7244_s3 + $0x600] ss:$16 sps:$4 sm:$0xff]  }
 0x1a4   :  { %3737 = vmatpush1.bf16.msra.mxu0 %v5179_v14  ;;  %3901 = vmatpush1.bf16.msra.mxu1 %v5182_v15  ;;  %v2012_v14 = vrot.slane %v6500_v31, %v2011_v5  ;;  %v2016_v15 = vrot.slane %v6500_v31, %v2015_v6  ;;  %v5260_v31 = vld [vmem:[%s7244_s3 + $0x568] ss:$16 sps:$4 sm:$0xff]  }
 0x1a5   :  { %3738 = vmatprep.subr.bf16.mxu0 %v5187_v16  ;;  %3902 = vmatprep.subr.bf16.mxu1 %v5190_v17  ;;  %v5259_v16 = vld [vmem:[%s7244_s3 + $0x564] ss:$16 sps:$4 sm:$0xff]   ;;  %v5262_v17 = vld [vmem:[%s7244_s3 + $0x56c] ss:$16 sps:$4 sm:$0xff]   ;;  %v5290_v5 = vld [vmem:[%s7244_s3 + $0x608] ss:$16 sps:$4 sm:$0xff]  }
 0x1a8   :  { %3739 = vmatpush1.bf16.msra.mxu0 %v5185_v18  ;;  %3903 = vmatpush1.bf16.msra.mxu1 %v5188_v19  ;;  %v5257_v18 = vld [vmem:[%s7244_s3 + $0x560] ss:$16 sps:$4 sm:$0xff]   ;;  %v2034_v19 = vcombine.low %v2004_v10, %v2008_v13  ;;  %v5298_v10 = vld [vmem:[%s7244_s3 + $0x62c] ss:$16 sps:$4 sm:$0xff]   ;;  %v5301_v13 = vld [vmem:[%s7244_s3 + $0x644] ss:$16 sps:$4 sm:$0xff]  }
 0x1a9   :  { %3749 = vmatprep.subr.bf16.mxu0 %v5193_v20  ;;  %3913 = vmatprep.subr.bf16.mxu1 %v5196_v22  ;;  %v2035_v20 = vcombine.low %v2012_v14, %v2016_v15  ;;  %v5265_v22 = vld [vmem:[%s7244_s3 + $0x584] ss:$16 sps:$4 sm:$0xff]   ;;  %v5304_v14 = vld [vmem:[%s7244_s3 + $0x64c] ss:$16 sps:$4 sm:$0xff]   ;;  %v5299_v15 = vld [vmem:[%s7244_s3 + $0x640] ss:$16 sps:$4 sm:$0xff]  }
 0x1ab   :  { %3741 = vmatmul.mubr.bf16.vlgmr.msra.gmra.mrb[8].mxu0 %v2103_v25  ;;  %3905 = vmatmul.mubr.bf16.vlgmr.msra.gmra.mrb[8].mxu1 %v2103_v25 }
 0x1ac   :  { %3750 = vmatpush1.bf16.msra.mxu0 %v5191_v23  ;;  %3914 = vmatpush1.bf16.msra.mxu1 %v5194_v24  ;;  %v5268_v23 = vld [vmem:[%s7244_s3 + $0x58c] ss:$16 sps:$4 sm:$0xff]  }
 0x1ad   :  { %3751 = vmatprep.subr.bf16.mxu0 %v5199_v26  ;;  %3915 = vmatprep.subr.bf16.mxu1 %v5202_v27  ;;  %v2042_v27 = vrot.slane %v2034_v19, %v6515_v49  ;;  %v5308_v19 = vld [vmem:[%s7244_s3 + $0x668] ss:$16 sps:$4 sm:$0xff]  }
 0x1b0   :  { %3752 = vmatpush1.bf16.msra.mxu0 %v5197_v56  ;;  %3916 = vmatpush1.bf16.msra.mxu1 %v5200_v9  ;;  %v2049_v56 = vrot.slane %v2035_v20, %v6515_v49  ;;  %v5263_v9 = vld [vmem:[%s7244_s3 + $0x580] ss:$16 sps:$4 sm:$0xff]   ;;  %v5313_v20 = vld [vmem:[%s7244_s3 + $0x684] ss:$16 sps:$4 sm:$0xff]  }
 0x1b1   :  { %3753 = vmatprep.subr.bf16.mxu0 %v5205_v59  ;;  %3917 = vmatprep.subr.bf16.mxu1 %v5208_v28  ;;  %v5266_v59 = vld [vmem:[%s7244_s3 + $0x588] ss:$16 sps:$4 sm:$0xff]  }
 0x1b4   :  { %3754 = vmatpush1.bf16.msra.mxu0 %v5203_v29  ;;  %3918 = vmatpush1.bf16.msra.mxu1 %v5206_v32 }
 0x1b5   :  { %3755 = vmatprep.subr.bf16.mxu0 %v5211_v33  ;;  %3919 = vmatprep.subr.bf16.mxu1 %v5214_v34  ;;  %v5271_v33 = vld [vmem:[%s7244_s3 + $0x5a4] ss:$16 sps:$4 sm:$0xff]   ;;  %v5274_v34 = vld [vmem:[%s7244_s3 + $0x5ac] ss:$16 sps:$4 sm:$0xff]  }
 0x1b8   :  { %3756 = vmatpush1.bf16.msra.mxu0 %v5209_v35  ;;  %3920 = vmatpush1.bf16.msra.mxu1 %v5212_v36 }
 0x1b9   :  { %3757 = vmatprep.subr.bf16.mxu0 %v5217_v37  ;;  %3921 = vmatprep.subr.bf16.mxu1 %v5220_v38 }
 0x1bc   :  { %3758 = vmatpush1.bf16.msra.mxu0 %v5215_v43  ;;  %3922 = vmatpush1.bf16.msra.mxu1 %v5218_v44 }
 0x1bd   :  { %3759 = vmatprep.subr.bf16.mxu0 %v5223_v45  ;;  %3923 = vmatprep.subr.bf16.mxu1 %v5226_v46  ;;  %v2050_v45 = vcombine.low %v2042_v27, %v2049_v56  ;;  %v5269_v46 = vld [vmem:[%s7244_s3 + $0x5a0] ss:$16 sps:$4 sm:$0xff]   ;;  %v5320_v56 = vld [vmem:[%s7244_s3 + $0x6a8] ss:$16 sps:$4 sm:$0xff]  }
 0x1be   :  { %v5317_v27 = vld [vmem:[%s7244_s3 + $0x6a0] ss:$16 sps:$4 sm:$0xff]  }
 0x1c0   :  { %3760 = vmatpush1.bf16.msra.mxu0 %v5221_v48  ;;  %3924 = vmatpush1.bf16.msra.mxu1 %v5224_v50  ;;  %v5272_v48 = vld [vmem:[%s7244_s3 + $0x5a8] ss:$16 sps:$4 sm:$0xff]   ;;  %v5277_v50 = vld [vmem:[%s7244_s3 + $0x5c4] ss:$16 sps:$4 sm:$0xff]  }
 0x1c1   :  { %3761 = vmatprep.subr.bf16.mxu0 %v5229_v51  ;;  %3925 = vmatprep.subr.bf16.mxu1 %v5232_v52  ;;  %v5280_v51 = vld [vmem:[%s7244_s3 + $0x5cc] ss:$16 sps:$4 sm:$0xff]  }
 0x1c4   :  { %3762 = vmatpush1.bf16.msra.mxu0 %v5227_v53  ;;  %3926 = vmatpush1.bf16.msra.mxu1 %v5230_v54  ;;  %v5275_v54 = vld [vmem:[%s7244_s3 + $0x5c0] ss:$16 sps:$4 sm:$0xff]  }
 0x1c5   :  { %3763 = vmatprep.subr.bf16.mxu0 %v5235_v21  ;;  %3927 = vmatprep.subr.bf16.mxu1 %v5238_v3  ;;  %v5278_v21 = vld [vmem:[%s7244_s3 + $0x5c8] ss:$16 sps:$4 sm:$0xff]   ;;  %v5283_v3 = vld [vmem:[%s7244_s3 + $0x5e4] ss:$16 sps:$4 sm:$0xff]  }
 0x1c8   :  { %3764 = vmatpush1.bf16.msra.mxu0 %v5233_v55  ;;  %3928 = vmatpush1.bf16.msra.mxu1 %v5236_v57  ;;  %v5286_v55 = vld [vmem:[%s7244_s3 + $0x5ec] ss:$16 sps:$4 sm:$0xff]  }
 0x1c9   :  { %3765 = vmatprep.subr.bf16.mxu0 %v5241_v58  ;;  %3929 = vmatprep.subr.bf16.mxu1 %v5244_v60  ;;  %v5281_v58 = vld [vmem:[%s7244_s3 + $0x5e0] ss:$16 sps:$4 sm:$0xff]   ;;  %v5284_v60 = vld [vmem:[%s7244_s3 + $0x5e8] ss:$16 sps:$4 sm:$0xff]  }
 0x1cc   :  { %3766 = vmatpush1.bf16.msra.mxu0 %v5239_v61  ;;  %3930 = vmatpush1.bf16.msra.mxu1 %v5242_v62 }
 0x1cd   :  { %3767 = vmatprep.subr.bf16.mxu0 %v5247_v30  ;;  %3931 = vmatprep.subr.bf16.mxu1 %v5250_v63  ;;  %v5289_v30 = vld [vmem:[%s7244_s3 + $0x604] ss:$16 sps:$4 sm:$0xff]   ;;  %v5292_v63 = vld [vmem:[%s7244_s3 + $0x60c] ss:$16 sps:$4 sm:$0xff]  }
 0x1d0   :  { %3768 = vmatpush1.bf16.msra.mxu0 %v5245_v0  ;;  %3932 = vmatpush1.bf16.msra.mxu1 %v5248_v2 }
 0x1d1   :  { %3769 = vmatprep.subr.bf16.mxu0 %v5253_v7  ;;  %3933 = vmatprep.subr.bf16.mxu1 %v5256_v8  ;;  %v5295_v8 = vld [vmem:[%s7244_s3 + $0x624] ss:$16 sps:$4 sm:$0xff]  }
 0x1d4   :  { %3770 = vmatpush1.bf16.msra.mxu0 %v5251_v11  ;;  %3934 = vmatpush1.bf16.msra.mxu1 %v5254_v12  ;;  %v5293_v11 = vld [vmem:[%s7244_s3 + $0x620] ss:$16 sps:$4 sm:$0xff]   ;;  %v5296_v12 = vld [vmem:[%s7244_s3 + $0x628] ss:$16 sps:$4 sm:$0xff]  }
 0x1d5   :  { %3771 = vmatprep.subr.bf16.mxu0 %v5259_v16  ;;  %3935 = vmatprep.subr.bf16.mxu1 %v5262_v17  ;;  %v5302_v16 = vld [vmem:[%s7244_s3 + $0x648] ss:$16 sps:$4 sm:$0xff]   ;;  %v5307_v17 = vld [vmem:[%s7244_s3 + $0x664] ss:$16 sps:$4 sm:$0xff]  }
 0x1d8   :  { %v1841_v24 = vpop.f32.mrb[4].mxu0  ;;  %3772 = vmatpush1.bf16.msra.mxu0 %v5257_v18  ;;  %3936 = vmatpush1.bf16.msra.mxu1 %v5260_v31  ;;  %v5310_v18 = vld [vmem:[%s7244_s3 + $0x66c] ss:$16 sps:$4 sm:$0xff]   ;;  %v5305_v31 = vld [vmem:[%s7244_s3 + $0x660] ss:$16 sps:$4 sm:$0xff]  }
 0x1d9   :  { %v1923_v25 = vpop.f32.mrb[4].mxu1  ;;  %v1843_v26 = vpop.f32.mrb[5].mxu0  ;;  %3773 = vmatprep.subr.bf16.mxu0 %v5265_v22  ;;  %3937 = vmatprep.subr.bf16.mxu1 %v5268_v23  ;;  %v5316_v22 = vld [vmem:[%s7244_s3 + $0x68c] ss:$16 sps:$4 sm:$0xff]   ;;  %v5311_v23 = vld [vmem:[%s7244_s3 + $0x680] ss:$16 sps:$4 sm:$0xff]  }
 0x1da   :  { %v1955_v28 = vcombine.low %v1841_v24, %v1843_v26  ;;  %v1925_v29 = vpop.f32.mrb[5].mxu1  ;;  %v1845_v32 = vpop.f32.mrb[6].mxu0  ;;  %v5314_v24 = vld [vmem:[%s7244_s3 + $0x688] ss:$16 sps:$4 sm:$0xff]   ;;  %v5322_v26 = vld [vmem:[%s7244_s3 + $0x6ac] ss:$16 sps:$4 sm:$0xff]  }
 0x1db   :  { %v1956_v35 = vcombine.low %v1923_v25, %v1925_v29  ;;  %v1927_v36 = vpop.f32.mrb[6].mxu1  ;;  %v1846_v37 = vpop.f32.mrb[7].mxu0  ;;  %v5319_v25 = vld [vmem:[%s7244_s3 + $0x6a4] ss:$16 sps:$4 sm:$0xff]   ;;  %v5326_v29 = vld [vmem:[%s7244_s3 + $0x6c8] ss:$16 sps:$4 sm:$0xff]  }
 0x1dc   :  { %v1963_v38 = vrot.slane %v1955_v28, %v6515_v49  ;;  %v1928_v43 = vpop.f32.mrb[7].mxu1  ;;  %3774 = vmatpush1.bf16.msra.mxu0 %v5263_v9  ;;  %3938 = vmatpush1.bf16.msra.mxu1 %v5266_v59  ;;  %v5325_v9 = vld [vmem:[%s7244_s3 + $0x6c4] ss:$16 sps:$4 sm:$0xff]   ;;  %v5328_v59 = vld [vmem:[%s7244_s3 + $0x6cc] ss:$16 sps:$4 sm:$0xff]  }
 0x1dd   :  { %v1970_v44 = vrot.slane %v1956_v35, %v6515_v49  ;;  %3775 = vmatprep.subr.bf16.mxu0 %v5271_v33  ;;  %3939 = vmatprep.subr.bf16.mxu1 %v5274_v34  ;;  %v5323_v28 = vld [vmem:[%s7244_s3 + $0x6c0] ss:$16 sps:$4 sm:$0xff]   ;;  %v5331_v32 = vld [vmem:[%s7244_s3 + $0x6e4] ss:$16 sps:$4 sm:$0xff]   ;;  %v5334_v33 = vld [vmem:[%s7244_s3 + $0x6ec] ss:$16 sps:$4 sm:$0xff]  }
 0x1de   :  { %v5329_v34 = vld [vmem:[%s7244_s3 + $0x6e0] ss:$16 sps:$4 sm:$0xff]   ;;  %v5332_v35 = vld [vmem:[%s7244_s3 + $0x6e8] ss:$16 sps:$4 sm:$0xff]   ;;  %v5337_v36 = vld [vmem:[%s7244_s3 + $0x704] ss:$16 sps:$4 sm:$0xff]  }
 0x1df   :  { %v1971_v52 = vcombine.low %v1963_v38, %v1970_v44  ;;  %v5340_v37 = vld [vmem:[%s7244_s3 + $0x70c] ss:$16 sps:$4 sm:$0xff]   ;;  %v5335_v38 = vld [vmem:[%s7244_s3 + $0x700] ss:$16 sps:$4 sm:$0xff]   ;;  %v5338_v43 = vld [vmem:[%s7244_s3 + $0x708] ss:$16 sps:$4 sm:$0xff]  }
 0x1e0   :  { %3776 = vmatpush1.bf16.msra.mxu0 %v5269_v46  ;;  %3940 = vmatpush1.bf16.msra.mxu1 %v5272_v48  ;;  %v5343_v44 = vld [vmem:[%s7244_s3 + $0x724] ss:$16 sps:$4 sm:$0xff]   ;;  %v5341_v46 = vld [vmem:[%s7244_s3 + $0x720] ss:$16 sps:$4 sm:$0xff]   ;;  %v5344_v48 = vld [vmem:[%s7244_s3 + $0x728] ss:$16 sps:$4 sm:$0xff]  }
 0x1e1   :  { %v2054_v53 = vadd.f32 %v2050_v45, %v1971_v52  ;;  %3777 = vmatprep.subr.bf16.mxu0 %v5277_v50  ;;  %3941 = vmatprep.subr.bf16.mxu1 %v5280_v51  ;;  %v5346_v45 = vld [vmem:[%s7244_s3 + $0x72c] ss:$16 sps:$4 sm:$0xff]   ;;  %v5349_v50 = vld [vmem:[%s7244_s3 + $0x744] ss:$16 sps:$4 sm:$0xff]   ;;  %v5347_v52 = vld [vmem:[%s7244_s3 + $0x740] ss:$16 sps:$4 sm:$0xff]  }
 0x1e2   :  { %v5352_v51 = vld [vmem:[%s7244_s3 + $0x74c] ss:$16 sps:$4 sm:$0xff]  }
 0x1e3   :  { %v2056_v57 = vmax.f32 %v2054_v53, 0.0  ;;  %v5350_v53 = vld [vmem:[%s7244_s3 + $0x748] ss:$16 sps:$4 sm:$0xff]  }
 0x1e4   :  { %3778 = vmatpush1.bf16.msra.mxu0 %v5275_v54  ;;  %3942 = vmatpush1.bf16.msra.mxu1 %v5278_v21  ;;  %v5355_v54 = vld [vmem:[%s7244_s3 + $0x764] ss:$16 sps:$4 sm:$0xff]   ;;  %v5358_v21 = vld [vmem:[%s7244_s3 + $0x76c] ss:$16 sps:$4 sm:$0xff]  }
 0x1e5   :  { %v2083_v61 = vrot.slane %v2056_v57, %v6515_v49  ;;  %v2076_v62 = vcombine.high %v2056_v57, %v2056_v57  ;;  %3779 = vmatprep.subr.bf16.mxu0 %v5283_v3  ;;  %3943 = vmatprep.subr.bf16.mxu1 %v5286_v55  ;;  %v5353_v3 = vld [vmem:[%s7244_s3 + $0x760] ss:$16 sps:$4 sm:$0xff]   ;;  %v5356_v55 = vld [vmem:[%s7244_s3 + $0x768] ss:$16 sps:$4 sm:$0xff]   ;;  %v5361_v57 = vld [vmem:[%s7244_s3 + $0x784] ss:$16 sps:$4 sm:$0xff]  }
 0x1e7   :  { %v2091_v0 = vcombine.high %v2083_v61, %v2083_v61  ;;  %v6927_v1 = vrot.slane %v2076_v62, %v6515_v49  ;;  %v2105_v7 = vpack.c.bf16 %v2083_v61, %v2083_v61  ;;  %v5362_v61 = vld [vmem:[%s7244_s3 + $0x788] ss:$16 sps:$4 sm:$0xff]   ;;  %v5367_v62 = vld [vmem:[%s7244_s3 + $0x7a4] ss:$16 sps:$4 sm:$0xff]  }
 0x1e8   :  { %3780 = vmatpush1.bf16.msra.mxu0 %v5281_v58  ;;  %3944 = vmatpush1.bf16.msra.mxu1 %v5284_v60  ;;  %v5364_v58 = vld [vmem:[%s7244_s3 + $0x78c] ss:$16 sps:$4 sm:$0xff]   ;;  %v5359_v60 = vld [vmem:[%s7244_s3 + $0x780] ss:$16 sps:$4 sm:$0xff]  }
 0x1e9   :  { %v2106_v2 = vpack.c.bf16 %v2091_v0, %v2091_v0  ;;  %v2092_v6 = vcombine.high %v6927_v1, %v6927_v1  ;;  %3790 = vmatprep.subr.bf16.mxu0 %v5289_v30  ;;  %3954 = vmatprep.subr.bf16.mxu1 %v5292_v63  ;;  %v5370_v30 = vld [vmem:[%s7244_s3 + $0x7ac] ss:$16 sps:$4 sm:$0xff]   ;;  %v5365_v63 = vld [vmem:[%s7244_s3 + $0x7a0] ss:$16 sps:$4 sm:$0xff]   ;;  %v5368_v0 = vld [vmem:[%s7244_s3 + $0x7a8] ss:$16 sps:$4 sm:$0xff]  }
 0x1eb   :  { %3781 = vmatprep.mubr.bf16.mxu0 %v2106_v2  ;;  %3945 = vmatprep.mubr.bf16.mxu1 %v2106_v2  ;;  %v2108_v49 = vpack.c.bf16 %v2092_v6, %v2092_v6  ;;  %v5373_v2 = vld [vmem:[%s7244_s3 + $0x7c4] ss:$16 sps:$4 sm:$0xff]   ;;  %v5374_v6 = vld [vmem:[%s7244_s3 + $0x7c8] ss:$16 sps:$4 sm:$0xff]  }
 0x1ec   :  { %3782 = vmatmul.mubr.bf16.vlgmr.msra.gmra.mrb[8].mxu0 %v2105_v7  ;;  %3946 = vmatmul.mubr.bf16.vlgmr.msra.gmra.mrb[8].mxu1 %v2105_v7  ;;  %v5379_v7 = vld [vmem:[%s7244_s3 + $0x7e4] ss:$16 sps:$4 sm:$0xff]  }
 0x1ed   :  { %3791 = vmatpush1.bf16.msra.mxu0 %v5287_v4  ;;  %3955 = vmatpush1.bf16.msra.mxu1 %v5290_v5  ;;  %v5376_v4 = vld [vmem:[%s7244_s3 + $0x7cc] ss:$16 sps:$4 sm:$0xff]   ;;  %v5371_v5 = vld [vmem:[%s7244_s3 + $0x7c0] ss:$16 sps:$4 sm:$0xff]  }
 0x1ee   :  { %3822 = vmatprep.mubr.bf16.mxu0 %v2108_v49  ;;  %3986 = vmatprep.mubr.bf16.mxu1 %v2108_v49  ;;  %v5382_v49 = vld [vmem:[%s7244_s3 + $0x7ec] ss:$16 sps:$4 sm:$0xff]  }
 0x1ef   :  { %3792 = vmatprep.subr.bf16.mxu0 %v5295_v8  ;;  %3956 = vmatprep.subr.bf16.mxu1 %v5298_v10  ;;  %v5377_v8 = vld [vmem:[%s7244_s3 + $0x7e0] ss:$16 sps:$4 sm:$0xff]   ;;  %v5380_v10 = vld [vmem:[%s7244_s3 + $0x7e8] ss:$16 sps:$4 sm:$0xff]  }
 0x1f1   :  { %3793 = vmatpush1.bf16.msra.mxu0 %v5293_v11  ;;  %3957 = vmatpush1.bf16.msra.mxu1 %v5296_v12  ;;  %v5383_v11 = vld [vmem:[%s7246_s5 + $0x40] sm:$0xff]  }
 0x1f2   :  { %3794 = vmatprep.subr.bf16.mxu0 %v5301_v13  ;;  %3958 = vmatprep.subr.bf16.mxu1 %v5304_v14  ;;  %v5384_v12 = vld [vmem:[%s7246_s5 + $0xc0] sm:$0xff]  }
 0x1f3   :  { %v5385_v13 = vld [vmem:[%s7246_s5] sm:$0xff]  }
 0x1f4   :  { %v5386_v14 = vld [vmem:[%s7246_s5 + $0x80] sm:$0xff]  }
 0x1f5   :  { %3795 = vmatpush1.bf16.msra.mxu0 %v5299_v15  ;;  %3959 = vmatpush1.bf16.msra.mxu1 %v5302_v16  ;;  %v2107_v15 = vpack.c.bf16 %v6927_v1, %v6927_v1  ;;  %v5387_v16 = vld [vmem:[%s7246_s5 + $0x48] sm:$0xff]  }
 0x1f6   :  { %3796 = vmatprep.subr.bf16.mxu0 %v5307_v17  ;;  %3960 = vmatprep.subr.bf16.mxu1 %v5310_v18  ;;  %v5388_v17 = vld [vmem:[%s7246_s5 + $0xc8] sm:$0xff]  }
 0x1f7   :  { %v5389_v18 = vld [vmem:[%s7246_s5 + $0x8] sm:$0xff]  }
 0x1f8   :  { %v5390_v1 = vld [vmem:[%s7246_s5 + $0x88] sm:$0xff]  }
 0x1f9   :  { %3797 = vmatpush1.bf16.msra.mxu0 %v5305_v31  ;;  %3961 = vmatpush1.bf16.msra.mxu1 %v5308_v19  ;;  %v5391_v31 = vld [vmem:[%s7246_s5 + $0x50] sm:$0xff]  }
 0x1fa   :  { %3798 = vmatprep.subr.bf16.mxu0 %v5313_v20  ;;  %3962 = vmatprep.subr.bf16.mxu1 %v5316_v22  ;;  %v5392_v19 = vld [vmem:[%s7246_s5 + $0xd0] sm:$0xff]  }
 0x1fb   :  { %v5393_v20 = vld [vmem:[%s7246_s5 + $0x10] sm:$0xff]  }
 0x1fc   :  { %v5394_v22 = vld [vmem:[%s7246_s5 + $0x90] sm:$0xff]  }
 0x1fd   :  { %3799 = vmatpush1.bf16.msra.mxu0 %v5311_v23  ;;  %3963 = vmatpush1.bf16.msra.mxu1 %v5314_v24  ;;  %v5395_v23 = vld [vmem:[%s7246_s5 + $0x58] sm:$0xff]  }
 0x1fe   :  { %3800 = vmatprep.subr.bf16.mxu0 %v5319_v25  ;;  %3964 = vmatprep.subr.bf16.mxu1 %v5322_v26  ;;  %v5396_v24 = vld [vmem:[%s7246_s5 + $0xd8] sm:$0xff]  }
 0x1ff   :  { %v5397_v25 = vld [vmem:[%s7246_s5 + $0x18] sm:$0xff]  }
 0x200   :  { %v5398_v26 = vld [vmem:[%s7246_s5 + $0x98] sm:$0xff]  }
 0x201   :  { %3801 = vmatpush1.bf16.msra.mxu0 %v5317_v27  ;;  %3965 = vmatpush1.bf16.msra.mxu1 %v5320_v56  ;;  %v5399_v27 = vld [vmem:[%s7246_s5 + $0x60] sm:$0xff]  }
 0x202   :  { %3802 = vmatprep.subr.bf16.mxu0 %v5325_v9  ;;  %3966 = vmatprep.subr.bf16.mxu1 %v5328_v59  ;;  %v5400_v56 = vld [vmem:[%s7246_s5 + $0xe0] sm:$0xff]  }
 0x203   :  { %v5401_v9 = vld [vmem:[%s7246_s5 + $0x20] sm:$0xff]  }
 0x204   :  { %v5402_v59 = vld [vmem:[%s7246_s5 + $0xa0] sm:$0xff]  }
 0x205   :  { %3803 = vmatpush1.bf16.msra.mxu0 %v5323_v28  ;;  %3967 = vmatpush1.bf16.msra.mxu1 %v5326_v29  ;;  %v5403_v28 = vld [vmem:[%s7246_s5 + $0x68] sm:$0xff]  }
 0x206   :  { %3804 = vmatprep.subr.bf16.mxu0 %v5331_v32  ;;  %3968 = vmatprep.subr.bf16.mxu1 %v5334_v33  ;;  %v5404_v29 = vld [vmem:[%s7246_s5 + $0xe8] sm:$0xff]  }
 0x207   :  { %v5405_v32 = vld [vmem:[%s7246_s5 + $0x28] sm:$0xff]  }
 0x208   :  { %v5406_v33 = vld [vmem:[%s7246_s5 + $0xa8] sm:$0xff]  }
 0x209   :  { %3805 = vmatpush1.bf16.msra.mxu0 %v5329_v34  ;;  %3969 = vmatpush1.bf16.msra.mxu1 %v5332_v35  ;;  %v5407_v34 = vld [vmem:[%s7246_s5 + $0x70] sm:$0xff]  }
 0x20a   :  { %3806 = vmatprep.subr.bf16.mxu0 %v5337_v36  ;;  %3970 = vmatprep.subr.bf16.mxu1 %v5340_v37  ;;  %v5408_v35 = vld [vmem:[%s7246_s5 + $0xf0] sm:$0xff]  }
 0x20b   :  { %v5409_v36 = vld [vmem:[%s7246_s5 + $0x30] sm:$0xff]  }
 0x20c   :  { %v5410_v37 = vld [vmem:[%s7246_s5 + $0xb0] sm:$0xff]  }
 0x20d   :  { %3807 = vmatpush1.bf16.msra.mxu0 %v5335_v38  ;;  %3971 = vmatpush1.bf16.msra.mxu1 %v5338_v43  ;;  %v5411_v38 = vld [vmem:[%s7246_s5 + $0x78] sm:$0xff]  }
 0x20e   :  { %3808 = vmatprep.subr.bf16.mxu0 %v5343_v44  ;;  %3972 = vmatprep.subr.bf16.mxu1 %v5346_v45  ;;  %v5412_v43 = vld [vmem:[%s7246_s5 + $0xf8] sm:$0xff]  }
 0x20f   :  { %v5413_v44 = vld [vmem:[%s7246_s5 + $0x38] sm:$0xff]  }
 0x210   :  { %v5414_v45 = vld [vmem:[%s7246_s5 + $0xb8] sm:$0xff]  }
 0x211   :  { %3809 = vmatpush1.bf16.msra.mxu0 %v5341_v46  ;;  %3973 = vmatpush1.bf16.msra.mxu1 %v5344_v48  ;;  %v2365_v46 = vld [vmem:[%s7245_s4] sm:$0xf] }
 0x212   :  { %3810 = vmatprep.subr.bf16.mxu0 %v5349_v50  ;;  %3974 = vmatprep.subr.bf16.mxu1 %v5352_v51  ;;  %v2370_v48 = vrot.slane %v2365_v46, %v1987_v39  ;;  %v2378_v50 = vrot.slane %v2365_v46, %v1995_v41  ;;  %v2374_v51 = vrot.slane %v2365_v46, %v1991_v40 }
 0x215   :  { %3811 = vmatpush1.bf16.msra.mxu0 %v5347_v52  ;;  %3975 = vmatpush1.bf16.msra.mxu1 %v5350_v53  ;;  %v2382_v52 = vrot.slane %v2365_v46, %v1999_v42 }
 0x216   :  { %3812 = vmatprep.subr.bf16.mxu0 %v5355_v54  ;;  %3976 = vmatprep.subr.bf16.mxu1 %v5358_v21 }
 0x219   :  { %3813 = vmatpush1.bf16.msra.mxu0 %v5353_v3  ;;  %3977 = vmatpush1.bf16.msra.mxu1 %v5356_v55 }
 0x21a   :  { %3814 = vmatprep.subr.bf16.mxu0 %v5361_v57  ;;  %3978 = vmatprep.subr.bf16.mxu1 %v5364_v58 }
 0x21d   :  { %3815 = vmatpush1.bf16.msra.mxu0 %v5359_v60  ;;  %3979 = vmatpush1.bf16.msra.mxu1 %v5362_v61 }
 0x21e   :  { %3816 = vmatprep.subr.bf16.mxu0 %v5367_v62  ;;  %3980 = vmatprep.subr.bf16.mxu1 %v5370_v30 }
 0x221   :  { %3817 = vmatpush1.bf16.msra.mxu0 %v5365_v63  ;;  %3981 = vmatpush1.bf16.msra.mxu1 %v5368_v0 }
 0x222   :  { %3818 = vmatprep.subr.bf16.mxu0 %v5373_v2  ;;  %3982 = vmatprep.subr.bf16.mxu1 %v5376_v4 }
 0x225   :  { %3819 = vmatpush1.bf16.msra.mxu0 %v5371_v5  ;;  %3983 = vmatpush1.bf16.msra.mxu1 %v5374_v6 }
 0x226   :  { %3820 = vmatprep.subr.bf16.mxu0 %v5379_v7  ;;  %3984 = vmatprep.subr.bf16.mxu1 %v5382_v49  ;;  %v4875_v7 = vld [vmem:[%s7247_s6] ss:$0 sm:$0xff] }
 0x229   :  { %3821 = vmatpush1.bf16.msra.mxu0 %v5377_v8  ;;  %3985 = vmatpush1.bf16.msra.mxu1 %v5380_v10 }
 0x22a   :  { %4908 = vmatprep.subr.bf16.mxu0 %v5383_v11  ;;  %4930 = vmatprep.subr.bf16.mxu1 %v5384_v12 }
 0x22c   :  { %3823 = vmatmul.mubr.bf16.vlgmr.msra.gmra.mrb[8].mxu0 %v2107_v15  ;;  %3987 = vmatmul.mubr.bf16.vlgmr.msra.gmra.mrb[8].mxu1 %v2107_v15 }
 0x22d   :  { %4909 = vmatpush3.bf16.msra.mxu0 %v5385_v13  ;;  %4931 = vmatpush3.bf16.msra.mxu1 %v5386_v14 }
 0x22e   :  { %4910 = vmatprep.subr.bf16.mxu0 %v5387_v16  ;;  %4932 = vmatprep.subr.bf16.mxu1 %v5388_v17 }
 0x231   :  { %4911 = vmatpush3.bf16.msra.mxu0 %v5389_v18  ;;  %4933 = vmatpush3.bf16.msra.mxu1 %v5390_v1 }
 0x232   :  { %4912 = vmatprep.subr.bf16.mxu0 %v5391_v31  ;;  %4934 = vmatprep.subr.bf16.mxu1 %v5392_v19 }
 0x235   :  { %4913 = vmatpush3.bf16.msra.mxu0 %v5393_v20  ;;  %4935 = vmatpush3.bf16.msra.mxu1 %v5394_v22 }
 0x236   :  { %4914 = vmatprep.subr.bf16.mxu0 %v5395_v23  ;;  %4936 = vmatprep.subr.bf16.mxu1 %v5396_v24 }
 0x239   :  { %4915 = vmatpush3.bf16.msra.mxu0 %v5397_v25  ;;  %4937 = vmatpush3.bf16.msra.mxu1 %v5398_v26 }
 0x23a   :  { %4916 = vmatprep.subr.bf16.mxu0 %v5399_v27  ;;  %4938 = vmatprep.subr.bf16.mxu1 %v5400_v56 }
 0x23d   :  { %4917 = vmatpush3.bf16.msra.mxu0 %v5401_v9  ;;  %4939 = vmatpush3.bf16.msra.mxu1 %v5402_v59 }
 0x23e   :  { %4918 = vmatprep.subr.bf16.mxu0 %v5403_v28  ;;  %4940 = vmatprep.subr.bf16.mxu1 %v5404_v29 }
 0x241   :  { %4919 = vmatpush3.bf16.msra.mxu0 %v5405_v32  ;;  %4941 = vmatpush3.bf16.msra.mxu1 %v5406_v33 }
 0x242   :  { %4920 = vmatprep.subr.bf16.mxu0 %v5407_v34  ;;  %4942 = vmatprep.subr.bf16.mxu1 %v5408_v35 }
 0x245   :  { %4921 = vmatpush3.bf16.msra.mxu0 %v5409_v36  ;;  %4943 = vmatpush3.bf16.msra.mxu1 %v5410_v37 }
 0x246   :  { %4922 = vmatprep.subr.bf16.mxu0 %v5411_v38  ;;  %4944 = vmatprep.subr.bf16.mxu1 %v5412_v43 }
 0x249   :  { %4923 = vmatpush3.bf16.msra.mxu0 %v5413_v44  ;;  %4945 = vmatpush3.bf16.msra.mxu1 %v5414_v45 }
 0x2ff   :  { %v3824_v53 = vpop.f32.mrb[8].mxu0  ;;  %v3988_v54 = vpop.f32.mrb[8].mxu1 }
 0x300   :  { %v4952_v21 = vadd.f32 %v3824_v53, %v2370_v48  ;;  %v4954_v3 = vadd.f32 %v3988_v54, %v2378_v50  ;;  %v3826_v55 = vpop.f32.mrb[9].mxu0  ;;  %v3990_v57 = vpop.f32.mrb[9].mxu1 }
 0x301   :  { %v4953_v58 = vadd.f32 %v3826_v55, %v2374_v51  ;;  %v4955_v60 = vadd.f32 %v3990_v57, %v2382_v52  ;;  %v3828_v61 = vpop.f32.mrb[10].mxu0  ;;  %v3992_v62 = vpop.f32.mrb[10].mxu1 }
 0x302   :  { %v3995_v39 = vmax.f32 %v4952_v21, 0.0  ;;  %v3997_v30 = vmax.f32 %v4954_v3, 0.0  ;;  %v3829_v63 = vpop.f32.mrb[11].mxu0  ;;  %v3993_v41 = vpop.f32.mrb[11].mxu1 }
 0x303   :  { %v3996_v0 = vmax.f32 %v4953_v58, 0.0  ;;  %v3998_v2 = vmax.f32 %v4955_v60, 0.0 }
 0x304   :  { %v3999_v47 = vpack.c.bf16 %v3995_v39, %v3995_v39  ;;  %v4001_v42 = vpack.c.bf16 %v3997_v30, %v3997_v30 }
 0x305   :  { %v4000_v40 = vpack.c.bf16 %v3996_v0, %v3996_v0  ;;  %v4002_v4 = vpack.c.bf16 %v3998_v2, %v3998_v2 }
 0x307   :  { %4298 = vmatprep.mubr.bf16.mxu0 %v4000_v40  ;;  %4338 = vmatprep.mubr.bf16.mxu1 %v4002_v4 }
 0x308   :  { %4299 = vmatmul.mubr.bf16.vlgmr.msra.gmra.mrb[12].mxu0 %v3999_v47  ;;  %4339 = vmatmul.mubr.bf16.vlgmr.msra.gmra.mrb[12].mxu1 %v4001_v42 }
 0x3db   :  { %v4924_v5 = vpop.f32.mrb[12].mxu0  ;;  %v4946_v6 = vpop.f32.mrb[12].mxu1 }
 0x3dc   :  { %v4925_v49 = vpop.f32.mrb[13].mxu0  ;;  %v4947_v8 = vpop.f32.mrb[13].mxu1 }
 0x3dd   :  { %v4926_v10 = vadd.f32 %v4925_v49, %v4924_v5  ;;  %v4948_v11 = vadd.f32 %v4947_v8, %v4946_v6  ;;  %v4927_v12 = vpop.f32.mrb[14].mxu0  ;;  %v4949_v13 = vpop.f32.mrb[14].mxu1 }
 0x3de   :  { %v4928_v14 = vpop.f32.mrb[15].mxu0  ;;  %v4950_v15 = vpop.f32.mrb[15].mxu1 }
 0x3df   :  { %v4301_v16 = vadd.f32 %v4926_v10, %v4875_v7 }
 0x3e1   :  { %v4341_v17 = vadd.f32 %v4948_v11, %v4301_v16 }
 0x3e3   :  { %5415 = vtanh.f32 %v4341_v17 }
 0x3ed   :  { %v5416_v18 = vpop.eup %5415 }
 0x3ee   :  { %4347 = vst [vmem:[#allocation3] sm:$0x3] %v5416_v18 }
 0x3ef   :  { %5428 = shalt.err (!%p5425_p4)
}
 0x3f0   :  { %s5429_s24 = scalar_lea.hbm %s7248_s7, 32 }
 0x3f1   :  { %p5430_p5 = scmp.ne.s32.totalorder %s7248_s7, %s5429_s24  ;;  %p5433_p6 = scmp.lt.u32.totalorder %s5429_s24, %s7248_s7 }
 0x3f3   :  { %p5435_p7 = pnand %p5433_p6, %p5430_p5 }
 0x3f5   :  { %5438 = shalt.err (!%p5435_p7)
}
 0x3f6   :  { %4357 = dma.vmem_to_hbm [thread:$0]  %s4355_s21, 32, %s7248_s7, [#allocation4]  }
 0x3f7   :  { %5439 = dma.done.wait [#allocation4], 32  }
 0x3f8   :  { %5440 = vsyncadd [#allocation4], 4294967264 }
 0x3f9   :  { %4361 = vsyncpa [#allocation4], 1 }

</bundles_post_ra>
